<compile_context>
chip_gen: v5e
topology: v5e:2x2
jax: 0.10.0
libtpu: 0.0.40
codegen_flags: <defaults>
</compile_context>

<pallas_src>
import jax
import jax.numpy as jnp
from jax.experimental import pallas as pl
from jax.experimental.pallas import tpu as pltpu


def _round_up(v, m):
    return ((v + m - 1) // m) * m


# ----------------------------------------------------------------------------
# Fused kernel: encoder -> RWKV time-mixing -> decoder (one batch block/step)
# ----------------------------------------------------------------------------

def omniarch_fused_kernel(x_ref, g_ref,
                          wx_ref, wg_ref, be_ref,
                          mixk_ref, mixv_ref, mixr_ref,
                          wk_ref, wv_ref, wr_ref, wo_ref,
                          decay_ref, first_ref,
                          wd_ref, bd_ref,
                          out_ref,
                          wkv_scr):
    """Time-major layout: x block (ts, B, G), out block (ts, B, Gop).

    B = 8 batch rows per grid step (sublane axis); Hp / Gop are padded to
    multiples of 128 lanes, so each per-timestep slab is one dense (8, 128)
    tile and all stores are aligned and unmasked.
    """
    ts, B, G = x_ref.shape
    Hp = wk_ref.shape[0]
    Gop = wd_ref.shape[1]

    # ---------------- encoder: tokens = GELU(x @ Wx + grid @ Wg + b) --------
    xb = x_ref[...].astype(jnp.bfloat16).reshape(ts * B, G)
    h = jnp.dot(xb, wx_ref[...], preferred_element_type=jnp.float32)
    # grid embedding computed ONCE per batch block (constant across time).
    gemb = jnp.dot(g_ref[...].astype(jnp.bfloat16), wg_ref[...],
                   preferred_element_type=jnp.float32)            # (B, Hp)
    h = h.reshape(ts, B, Hp) + gemb[None, :, :] + be_ref[...]
    tok = jax.nn.gelu(h, approximate=True)                        # (ts, B, Hp) f32

    # ---------------- RWKV time mixing --------------------------------------
    # Token shift along the leading, tile-aligned time axis:
    # x_prev[t] = tok[t-1], x_prev[0] = 0.
    x_prev = jnp.concatenate(
        [jnp.zeros((1, B, Hp), tok.dtype), tok[:-1]], axis=0)

    mk = mixk_ref[...]
    mv = mixv_ref[...]
    mr = mixr_ref[...]
    xk = (tok * mk + x_prev * (1.0 - mk)).astype(jnp.bfloat16).reshape(ts * B, Hp)
    xv = (tok * mv + x_prev * (1.0 - mv)).astype(jnp.bfloat16).reshape(ts * B, Hp)
    xr = (tok * mr + x_prev * (1.0 - mr)).astype(jnp.bfloat16).reshape(ts * B, Hp)

    # R / K / V projections batched over all ts*B rows (hoisted out of scan).
    k = jnp.dot(xk, wk_ref[...],
                preferred_element_type=jnp.float32).reshape(ts, B, Hp)
    v = jnp.dot(xv, wv_ref[...],
                preferred_element_type=jnp.float32).reshape(ts, B, Hp)
    r = jax.nn.sigmoid(
        jnp.dot(xr, wr_ref[...], preferred_element_type=jnp.float32)
    ).reshape(ts, B, Hp)

    w = -jnp.exp(decay_ref[...])                                  # (1, Hp)
    u = first_ref[...]                                            # (1, Hp)

    # Numerically stable WKV recurrence, vectorized over the batch sublanes
    # and fully unrolled over the small static time axis.
    aa = jnp.zeros((B, Hp), jnp.float32)
    bb = jnp.zeros((B, Hp), jnp.float32)
    pp = jnp.full((B, Hp), -1e30, jnp.float32)
    for t in range(ts):
        kt = k[t]                                                 # (B, Hp)
        vt = v[t]
        ww = u + kt
        p = jnp.maximum(pp, ww)
        e1 = jnp.exp(pp - p)
        e2 = jnp.exp(ww - p)
        num = e1 * aa + e2 * vt
        den = e1 * bb + e2
        wkv_scr[t] = r[t] * num * pl.reciprocal(den, approx=True)
        ww = pp + w
        p = jnp.maximum(ww, kt)
        e1 = jnp.exp(ww - p)
        e2 = jnp.exp(kt - p)
        aa = e1 * aa + e2 * vt
        bb = e1 * bb + e2
        pp = p

    # Output projection + residual, fused decoder projection (no HBM trip).
    y = jnp.dot(wkv_scr[...].astype(jnp.bfloat16).reshape(ts * B, Hp),
                wo_ref[...], preferred_element_type=jnp.float32)
    latent = y + tok.reshape(ts * B, Hp)
    dec = jnp.dot(latent.astype(jnp.bfloat16), wd_ref[...],
                  preferred_element_type=jnp.float32) + bd_ref[...]
    out_ref[...] = dec.reshape(ts, B, Gop).astype(out_ref.dtype)


# ----------------------------------------------------------------------------
# Wrapper
# ----------------------------------------------------------------------------

_VMEM = pl.BlockSpec(memory_space=pltpu.MemorySpace.VMEM)   # untiled VMEM input


def init_params(key, grid_size, hidden):
    ks = jax.random.split(key, 12)
    s_in = 1.0 / jnp.sqrt(grid_size)
    s_h = 1.0 / jnp.sqrt(hidden)
    return {
        "wx": jax.random.normal(ks[0], (grid_size, hidden), jnp.float32) * s_in,
        "wg": jax.random.normal(ks[1], (grid_size, hidden), jnp.float32) * s_in,
        "be": jnp.zeros((1, hidden), jnp.float32),
        "mixk": jax.random.uniform(ks[2], (1, hidden), jnp.float32),
        "mixv": jax.random.uniform(ks[3], (1, hidden), jnp.float32),
        "mixr": jax.random.uniform(ks[4], (1, hidden), jnp.float32),
        "wk": jax.random.normal(ks[5], (hidden, hidden), jnp.float32) * s_h,
        "wv": jax.random.normal(ks[6], (hidden, hidden), jnp.float32) * s_h,
        "wr": jax.random.normal(ks[7], (hidden, hidden), jnp.float32) * s_h,
        "wo": jax.random.normal(ks[8], (hidden, hidden), jnp.float32) * s_h,
        "decay": jax.random.normal(ks[9], (1, hidden), jnp.float32) * 0.1,
        "first": jax.random.normal(ks[10], (1, hidden), jnp.float32) * 0.1,
        "wd": jax.random.normal(ks[11], (hidden, grid_size + 2), jnp.float32) * s_h,
        "bd": jnp.zeros((1, grid_size + 2), jnp.float32),
    }


@jax.jit
def omniarch_rwkv_forward(x, grid, params):
    """x: (bsz, ts, grid_size), grid: (bsz, grid_size) -> (bsz, ts, grid_size+2)."""
    bsz, ts, G = x.shape
    H = params["wx"].shape[1]
    Go = G + 2

    Hp = _round_up(H, 128)     # lane-dense hidden
    Gop = _round_up(Go, 128)   # lane-dense decoder output
    B_blk = 8                  # sublane-aligned batch block
    Bp = _round_up(bsz, B_blk)

    bf16 = jnp.bfloat16

    def pad2(a, rows, cols):
        return jnp.pad(a, ((0, rows - a.shape[0]), (0, cols - a.shape[1])))

    wx = pad2(params["wx"], G, Hp).astype(bf16)
    wg = pad2(params["wg"], G, Hp).astype(bf16)
    be = pad2(params["be"], 1, Hp)
    mixk = pad2(params["mixk"], 1, Hp)
    mixv = pad2(params["mixv"], 1, Hp)
    mixr = pad2(params["mixr"], 1, Hp)
    wk = pad2(params["wk"], Hp, Hp).astype(bf16)
    wv = pad2(params["wv"], Hp, Hp).astype(bf16)
    wr = pad2(params["wr"], Hp, Hp).astype(bf16)
    wo = pad2(params["wo"], Hp, Hp).astype(bf16)
    decay = pad2(params["decay"], 1, Hp)
    first = pad2(params["first"], 1, Hp)
    wd = pad2(params["wd"], Hp, Gop).astype(bf16)
    bd = pad2(params["bd"], 1, Gop)

    # Time-major activations, batch padded to a sublane multiple.
    x_tm = jnp.transpose(x, (1, 0, 2))                       # (ts, bsz, G)
    x_tm = jnp.pad(x_tm, ((0, 0), (0, Bp - bsz), (0, 0)))    # (ts, Bp, G)
    grid_p = jnp.pad(grid, ((0, Bp - bsz), (0, 0)))          # (Bp, G)

    cost = pl.CostEstimate(
        flops=(2 * ts * Bp * G * Hp + 2 * Bp * G * Hp        # encoder
               + 4 * 2 * ts * Bp * Hp * Hp                   # k/v/r/out proj
               + 2 * ts * Bp * Hp * Gop),                    # decoder
        transcendentals=7 * ts * Bp * Hp,
        bytes_accessed=(4 * ts * Bp * (G + Gop) + 4 * Bp * G
                        + 2 * (2 * G * Hp + 4 * Hp * Hp + Hp * Gop)
                        + 4 * 8 * Hp + 4 * Gop),
    )

    out_tm = pl.pallas_call(
        omniarch_fused_kernel,
        out_shape=jax.ShapeDtypeStruct((ts, Bp, Gop), jnp.float32),
        grid=(Bp // B_blk,),
        in_specs=[
            pl.BlockSpec((ts, B_blk, G), lambda b: (0, b, 0)),   # x (time-major)
            pl.BlockSpec((B_blk, G), lambda b: (b, 0)),          # grid rows
            _VMEM,   # wx
            _VMEM,   # wg
            _VMEM,   # be
            _VMEM,   # mixk
            _VMEM,   # mixv
            _VMEM,   # mixr
            _VMEM,   # wk
            _VMEM,   # wv
            _VMEM,   # wr
            _VMEM,   # wo
            _VMEM,   # decay
            _VMEM,   # first
            _VMEM,   # wd
            _VMEM,   # bd
        ],
        out_specs=pl.BlockSpec((ts, B_blk, Gop), lambda b: (0, b, 0)),
        scratch_shapes=[
            pltpu.VMEM((ts, B_blk, Hp), jnp.float32),            # r * wkv
        ],
        compiler_params=pltpu.CompilerParams(
            dimension_semantics=("parallel",),
            vmem_limit_bytes=48 * 1024 * 1024),
        cost_estimate=cost,
    )(x_tm, grid_p, wx, wg, be, mixk, mixv, mixr,
      wk, wv, wr, wo, decay, first, wd, bd)

    # Strip lane / sublane padding, back to batch-major.
    out = jnp.transpose(out_tm, (1, 0, 2))[:bsz, :, :Go]
    return out


# ----------------------------------------------------------------------------
# Main
# ----------------------------------------------------------------------------

if __name__ == "__main__":
    bsz, ts, grid_size, hidden = 2, 8, 16, 32

    key = jax.random.PRNGKey(0)
    kx, kg, kp = jax.random.split(key, 3)
    x = jax.random.normal(kx, (bsz, ts, grid_size), jnp.float32)
    grid = jax.random.uniform(kg, (bsz, grid_size), jnp.float32)
    params = init_params(kp, grid_size, hidden)

    out = omniarch_rwkv_forward(x, grid, params)
    jax.block_until_ready(out)

    assert out.shape == (bsz, ts, grid_size + 2), out.shape
    assert jnp.all(jnp.isfinite(out)), "non-finite output"
    print("KERNEL_OK")
</pallas_src>

<mosaic_0001>
module attributes {stable_mosaic.version = 11 : i64} {
  func.func @omniarch_fused_kernel(%arg0: i32, %arg1: memref<8x8x16xf32, #tpu.memory_space<vmem>>, %arg2: memref<8x16xf32, #tpu.memory_space<vmem>>, %arg3: memref<16x128xbf16, #tpu.memory_space<vmem>>, %arg4: memref<16x128xbf16, #tpu.memory_space<vmem>>, %arg5: memref<1x128xf32, #tpu.memory_space<vmem>>, %arg6: memref<1x128xf32, #tpu.memory_space<vmem>>, %arg7: memref<1x128xf32, #tpu.memory_space<vmem>>, %arg8: memref<1x128xf32, #tpu.memory_space<vmem>>, %arg9: memref<128x128xbf16, #tpu.memory_space<vmem>>, %arg10: memref<128x128xbf16, #tpu.memory_space<vmem>>, %arg11: memref<128x128xbf16, #tpu.memory_space<vmem>>, %arg12: memref<128x128xbf16, #tpu.memory_space<vmem>>, %arg13: memref<1x128xf32, #tpu.memory_space<vmem>>, %arg14: memref<1x128xf32, #tpu.memory_space<vmem>>, %arg15: memref<128x128xbf16, #tpu.memory_space<vmem>>, %arg16: memref<1x128xf32, #tpu.memory_space<vmem>>, %arg17: memref<8x8x128xf32, #tpu.memory_space<vmem>>, %arg18: memref<8x8x128xf32, #tpu.memory_space<vmem>>) attributes {dimension_semantics = [#tpu.dimension_semantics<parallel>], iteration_bounds = array<i64: 1>, scalar_prefetch = 0 : i64, scratch_operands = 1 : i64, tpu.core_type = #tpu.core_type<tc>, window_params = [{transform_indices = @transform_0, window_bounds = array<i64: 8, 8, 16>}, {transform_indices = @transform_1, window_bounds = array<i64: 8, 16>}, {pipeline_mode = #tpu.pipeline_mode<synchronous>, transform_indices = @transform_2, window_bounds = array<i64: 16, 128>}, {pipeline_mode = #tpu.pipeline_mode<synchronous>, transform_indices = @transform_3, window_bounds = array<i64: 16, 128>}, {pipeline_mode = #tpu.pipeline_mode<synchronous>, transform_indices = @transform_4, window_bounds = array<i64: 1, 128>}, {pipeline_mode = #tpu.pipeline_mode<synchronous>, transform_indices = @transform_5, window_bounds = array<i64: 1, 128>}, {pipeline_mode = #tpu.pipeline_mode<synchronous>, transform_indices = @transform_6, window_bounds = array<i64: 1, 128>}, {pipeline_mode = #tpu.pipeline_mode<synchronous>, transform_indices = @transform_7, window_bounds = array<i64: 1, 128>}, {pipeline_mode = #tpu.pipeline_mode<synchronous>, transform_indices = @transform_8, window_bounds = array<i64: 128, 128>}, {pipeline_mode = #tpu.pipeline_mode<synchronous>, transform_indices = @transform_9, window_bounds = array<i64: 128, 128>}, {pipeline_mode = #tpu.pipeline_mode<synchronous>, transform_indices = @transform_10, window_bounds = array<i64: 128, 128>}, {pipeline_mode = #tpu.pipeline_mode<synchronous>, transform_indices = @transform_11, window_bounds = array<i64: 128, 128>}, {pipeline_mode = #tpu.pipeline_mode<synchronous>, transform_indices = @transform_12, window_bounds = array<i64: 1, 128>}, {pipeline_mode = #tpu.pipeline_mode<synchronous>, transform_indices = @transform_13, window_bounds = array<i64: 1, 128>}, {pipeline_mode = #tpu.pipeline_mode<synchronous>, transform_indices = @transform_14, window_bounds = array<i64: 128, 128>}, {pipeline_mode = #tpu.pipeline_mode<synchronous>, transform_indices = @transform_15, window_bounds = array<i64: 1, 128>}, {transform_indices = @transform_16, window_bounds = array<i64: 8, 8, 128>}]} {
    %c0 = arith.constant 0 : index
    %c0_0 = arith.constant 0 : index
    %c0_1 = arith.constant 0 : index
    %0 = vector.load %arg1[%c0, %c0_0, %c0_1] : memref<8x8x16xf32, #tpu.memory_space<vmem>>, vector<8x8x16xf32>
    %1 = arith.truncf %0 : vector<8x8x16xf32> to vector<8x8x16xbf16>
    %2 = vector.shape_cast %1 : vector<8x8x16xbf16> to vector<64x16xbf16>
    %c0_2 = arith.constant 0 : index
    %c0_3 = arith.constant 0 : index
    %3 = vector.load %arg3[%c0_2, %c0_3] : memref<16x128xbf16, #tpu.memory_space<vmem>>, vector<16x128xbf16>
    %cst = arith.constant dense<0.000000e+00> : vector<64x128xf32>
    %4 = tpu.matmul %2, %3, %cst {dimension_numbers = #tpu.dot_dimension_numbers<[1], [0], [0], [1], [0, 0, 1, 1], [], []>} : vector<64x16xbf16>, vector<16x128xbf16>, vector<64x128xf32> -> vector<64x128xf32>
    %c0_4 = arith.constant 0 : index
    %c0_5 = arith.constant 0 : index
    %5 = vector.load %arg2[%c0_4, %c0_5] : memref<8x16xf32, #tpu.memory_space<vmem>>, vector<8x16xf32>
    %6 = arith.truncf %5 : vector<8x16xf32> to vector<8x16xbf16>
    %c0_6 = arith.constant 0 : index
    %c0_7 = arith.constant 0 : index
    %7 = vector.load %arg4[%c0_6, %c0_7] : memref<16x128xbf16, #tpu.memory_space<vmem>>, vector<16x128xbf16>
    %cst_8 = arith.constant dense<0.000000e+00> : vector<8x128xf32>
    %8 = tpu.matmul %6, %7, %cst_8 {dimension_numbers = #tpu.dot_dimension_numbers<[1], [0], [0], [1], [0, 0, 1, 1], [], []>} : vector<8x16xbf16>, vector<16x128xbf16>, vector<8x128xf32> -> vector<8x128xf32>
    %9 = vector.shape_cast %4 : vector<64x128xf32> to vector<8x8x128xf32>
    %10 = vector.shape_cast %8 : vector<8x128xf32> to vector<1x8x128xf32>
    %11 = vector.broadcast %10 : vector<1x8x128xf32> to vector<8x8x128xf32>
    %12 = arith.addf %9, %11 : vector<8x8x128xf32>
    %c0_9 = arith.constant 0 : index
    %c0_10 = arith.constant 0 : index
    %13 = vector.load %arg5[%c0_9, %c0_10] : memref<1x128xf32, #tpu.memory_space<vmem>>, vector<1x128xf32>
    %14 = vector.shape_cast %13 : vector<1x128xf32> to vector<1x1x128xf32>
    %15 = vector.broadcast %14 : vector<1x1x128xf32> to vector<8x8x128xf32>
    %16 = arith.addf %12, %15 : vector<8x8x128xf32>
    %17 = arith.mulf %16, %16 : vector<8x8x128xf32>
    %18 = arith.mulf %16, %17 : vector<8x8x128xf32>
    %cst_11 = arith.constant 4.471500e-02 : f32
    %19 = vector.broadcast %cst_11 : f32 to vector<8x8x128xf32>
    %20 = arith.mulf %19, %18 : vector<8x8x128xf32>
    %21 = arith.addf %16, %20 : vector<8x8x128xf32>
    %cst_12 = arith.constant 0.797884583 : f32
    %22 = vector.broadcast %cst_12 : f32 to vector<8x8x128xf32>
    %23 = arith.mulf %22, %21 : vector<8x8x128xf32>
    %24 = math.tanh %23 : vector<8x8x128xf32>
    %cst_13 = arith.constant 1.000000e+00 : f32
    %25 = vector.broadcast %cst_13 : f32 to vector<8x8x128xf32>
    %26 = arith.addf %25, %24 : vector<8x8x128xf32>
    %cst_14 = arith.constant 5.000000e-01 : f32
    %27 = vector.broadcast %cst_14 : f32 to vector<8x8x128xf32>
    %28 = arith.mulf %27, %26 : vector<8x8x128xf32>
    %29 = arith.mulf %16, %28 : vector<8x8x128xf32>
    %cst_15 = arith.constant 0.000000e+00 : f32
    %30 = vector.broadcast %cst_15 : f32 to vector<1x8x128xf32>
    %31 = vector.extract_strided_slice %29 {offsets = [0, 0, 0], sizes = [7, 8, 128], strides = [1, 1, 1]} : vector<8x8x128xf32> to vector<7x8x128xf32>
    %32 = tpu.concatenate %30, %31 in 0 : vector<1x8x128xf32>, vector<7x8x128xf32> -> vector<8x8x128xf32>
    %c0_16 = arith.constant 0 : index
    %c0_17 = arith.constant 0 : index
    %33 = vector.load %arg6[%c0_16, %c0_17] : memref<1x128xf32, #tpu.memory_space<vmem>>, vector<1x128xf32>
    %c0_18 = arith.constant 0 : index
    %c0_19 = arith.constant 0 : index
    %34 = vector.load %arg7[%c0_18, %c0_19] : memref<1x128xf32, #tpu.memory_space<vmem>>, vector<1x128xf32>
    %c0_20 = arith.constant 0 : index
    %c0_21 = arith.constant 0 : index
    %35 = vector.load %arg8[%c0_20, %c0_21] : memref<1x128xf32, #tpu.memory_space<vmem>>, vector<1x128xf32>
    %36 = vector.shape_cast %33 : vector<1x128xf32> to vector<1x1x128xf32>
    %37 = vector.broadcast %36 : vector<1x1x128xf32> to vector<8x8x128xf32>
    %38 = arith.mulf %29, %37 : vector<8x8x128xf32>
    %cst_22 = arith.constant 1.000000e+00 : f32
    %39 = vector.broadcast %cst_22 : f32 to vector<1x128xf32>
    %40 = arith.subf %39, %33 : vector<1x128xf32>
    %41 = vector.shape_cast %40 : vector<1x128xf32> to vector<1x1x128xf32>
    %42 = vector.broadcast %41 : vector<1x1x128xf32> to vector<8x8x128xf32>
    %43 = arith.mulf %32, %42 : vector<8x8x128xf32>
    %44 = arith.addf %38, %43 : vector<8x8x128xf32>
    %45 = arith.truncf %44 : vector<8x8x128xf32> to vector<8x8x128xbf16>
    %46 = vector.shape_cast %45 : vector<8x8x128xbf16> to vector<64x128xbf16>
    %47 = vector.shape_cast %34 : vector<1x128xf32> to vector<1x1x128xf32>
    %48 = vector.broadcast %47 : vector<1x1x128xf32> to vector<8x8x128xf32>
    %49 = arith.mulf %29, %48 : vector<8x8x128xf32>
    %cst_23 = arith.constant 1.000000e+00 : f32
    %50 = vector.broadcast %cst_23 : f32 to vector<1x128xf32>
    %51 = arith.subf %50, %34 : vector<1x128xf32>
    %52 = vector.shape_cast %51 : vector<1x128xf32> to vector<1x1x128xf32>
    %53 = vector.broadcast %52 : vector<1x1x128xf32> to vector<8x8x128xf32>
    %54 = arith.mulf %32, %53 : vector<8x8x128xf32>
    %55 = arith.addf %49, %54 : vector<8x8x128xf32>
    %56 = arith.truncf %55 : vector<8x8x128xf32> to vector<8x8x128xbf16>
    %57 = vector.shape_cast %56 : vector<8x8x128xbf16> to vector<64x128xbf16>
    %58 = vector.shape_cast %35 : vector<1x128xf32> to vector<1x1x128xf32>
    %59 = vector.broadcast %58 : vector<1x1x128xf32> to vector<8x8x128xf32>
    %60 = arith.mulf %29, %59 : vector<8x8x128xf32>
    %cst_24 = arith.constant 1.000000e+00 : f32
    %61 = vector.broadcast %cst_24 : f32 to vector<1x128xf32>
    %62 = arith.subf %61, %35 : vector<1x128xf32>
    %63 = vector.shape_cast %62 : vector<1x128xf32> to vector<1x1x128xf32>
    %64 = vector.broadcast %63 : vector<1x1x128xf32> to vector<8x8x128xf32>
    %65 = arith.mulf %32, %64 : vector<8x8x128xf32>
    %66 = arith.addf %60, %65 : vector<8x8x128xf32>
    %67 = arith.truncf %66 : vector<8x8x128xf32> to vector<8x8x128xbf16>
    %68 = vector.shape_cast %67 : vector<8x8x128xbf16> to vector<64x128xbf16>
    %c0_25 = arith.constant 0 : index
    %c0_26 = arith.constant 0 : index
    %69 = vector.load %arg9[%c0_25, %c0_26] : memref<128x128xbf16, #tpu.memory_space<vmem>>, vector<128x128xbf16>
    %cst_27 = arith.constant dense<0.000000e+00> : vector<64x128xf32>
    %70 = tpu.matmul %46, %69, %cst_27 {dimension_numbers = #tpu.dot_dimension_numbers<[1], [0], [0], [1], [0, 0, 1, 1], [], []>} : vector<64x128xbf16>, vector<128x128xbf16>, vector<64x128xf32> -> vector<64x128xf32>
    %71 = vector.shape_cast %70 : vector<64x128xf32> to vector<8x8x128xf32>
    %c0_28 = arith.constant 0 : index
    %c0_29 = arith.constant 0 : index
    %72 = vector.load %arg10[%c0_28, %c0_29] : memref<128x128xbf16, #tpu.memory_space<vmem>>, vector<128x128xbf16>
    %cst_30 = arith.constant dense<0.000000e+00> : vector<64x128xf32>
    %73 = tpu.matmul %57, %72, %cst_30 {dimension_numbers = #tpu.dot_dimension_numbers<[1], [0], [0], [1], [0, 0, 1, 1], [], []>} : vector<64x128xbf16>, vector<128x128xbf16>, vector<64x128xf32> -> vector<64x128xf32>
    %74 = vector.shape_cast %73 : vector<64x128xf32> to vector<8x8x128xf32>
    %c0_31 = arith.constant 0 : index
    %c0_32 = arith.constant 0 : index
    %75 = vector.load %arg11[%c0_31, %c0_32] : memref<128x128xbf16, #tpu.memory_space<vmem>>, vector<128x128xbf16>
    %cst_33 = arith.constant dense<0.000000e+00> : vector<64x128xf32>
    %76 = tpu.matmul %68, %75, %cst_33 {dimension_numbers = #tpu.dot_dimension_numbers<[1], [0], [0], [1], [0, 0, 1, 1], [], []>} : vector<64x128xbf16>, vector<128x128xbf16>, vector<64x128xf32> -> vector<64x128xf32>
    %77 = arith.negf %76 : vector<64x128xf32>
    %78 = math.exp %77 : vector<64x128xf32>
    %cst_34 = arith.constant 1.000000e+00 : f32
    %79 = vector.broadcast %cst_34 : f32 to vector<64x128xf32>
    %80 = arith.addf %79, %78 : vector<64x128xf32>
    %81 = arith.divf %79, %80 : vector<64x128xf32>
    %82 = vector.shape_cast %81 : vector<64x128xf32> to vector<8x8x128xf32>
    %c0_35 = arith.constant 0 : index
    %c0_36 = arith.constant 0 : index
    %83 = vector.load %arg13[%c0_35, %c0_36] : memref<1x128xf32, #tpu.memory_space<vmem>>, vector<1x128xf32>
    %84 = math.exp %83 : vector<1x128xf32>
    %cst_37 = arith.constant 0.000000e+00 : f32
    %85 = vector.broadcast %cst_37 : f32 to vector<1x128xf32>
    %86 = arith.subf %85, %84 : vector<1x128xf32>
    %c0_38 = arith.constant 0 : index
    %c0_39 = arith.constant 0 : index
    %87 = vector.load %arg14[%c0_38, %c0_39] : memref<1x128xf32, #tpu.memory_space<vmem>>, vector<1x128xf32>
    %cst_40 = arith.constant 0.000000e+00 : f32
    %88 = vector.broadcast %cst_40 : f32 to vector<8x128xf32>
    %cst_41 = arith.constant 0.000000e+00 : f32
    %89 = vector.broadcast %cst_41 : f32 to vector<8x128xf32>
    %cst_42 = arith.constant -1.000000e+30 : f32
    %90 = vector.broadcast %cst_42 : f32 to vector<8x128xf32>
    %91 = vector.extract_strided_slice %71 {offsets = [0, 0, 0], sizes = [1, 8, 128], strides = [1, 1, 1]} : vector<8x8x128xf32> to vector<1x8x128xf32>
    %92 = vector.shape_cast %91 : vector<1x8x128xf32> to vector<8x128xf32>
    %93 = vector.extract_strided_slice %74 {offsets = [0, 0, 0], sizes = [1, 8, 128], strides = [1, 1, 1]} : vector<8x8x128xf32> to vector<1x8x128xf32>
    %94 = vector.shape_cast %93 : vector<1x8x128xf32> to vector<8x128xf32>
    %95 = vector.broadcast %87 : vector<1x128xf32> to vector<8x128xf32>
    %96 = arith.addf %95, %92 : vector<8x128xf32>
    %97 = arith.maximumf %90, %96 : vector<8x128xf32>
    %98 = arith.subf %90, %97 : vector<8x128xf32>
    %99 = math.exp %98 : vector<8x128xf32>
    %100 = arith.subf %96, %97 : vector<8x128xf32>
    %101 = math.exp %100 : vector<8x128xf32>
    %102 = arith.mulf %99, %88 : vector<8x128xf32>
    %103 = arith.mulf %101, %94 : vector<8x128xf32>
    %104 = arith.addf %102, %103 : vector<8x128xf32>
    %105 = arith.mulf %99, %89 : vector<8x128xf32>
    %106 = arith.addf %105, %101 : vector<8x128xf32>
    %107 = vector.extract_strided_slice %82 {offsets = [0, 0, 0], sizes = [1, 8, 128], strides = [1, 1, 1]} : vector<8x8x128xf32> to vector<1x8x128xf32>
    %108 = vector.shape_cast %107 : vector<1x8x128xf32> to vector<8x128xf32>
    %109 = arith.mulf %108, %104 : vector<8x128xf32>
    %110 = tpu.reciprocal %106 {approx = true} : vector<8x128xf32> -> vector<8x128xf32>
    %111 = arith.mulf %109, %110 : vector<8x128xf32>
    %c0_43 = arith.constant 0 : index
    %c0_44 = arith.constant 0 : index
    %c0_45 = arith.constant 0 : index
    %112 = vector.load %arg18[%c0_43, %c0_44, %c0_45] : memref<8x8x128xf32, #tpu.memory_space<vmem>>, vector<1x8x128xf32>
    %113 = vector.shape_cast %112 : vector<1x8x128xf32> to vector<8x128xf32>
    %114 = vector.shape_cast %111 : vector<8x128xf32> to vector<1x8x128xf32>
    tpu.vector_store %arg18[%c0_43, %c0_44, %c0_45], %114 {strides = array<i32>} : memref<8x8x128xf32, #tpu.memory_space<vmem>>, vector<1x8x128xf32>,
    %115 = vector.broadcast %86 : vector<1x128xf32> to vector<8x128xf32>
    %116 = arith.addf %90, %115 : vector<8x128xf32>
    %117 = arith.maximumf %116, %92 : vector<8x128xf32>
    %118 = arith.subf %116, %117 : vector<8x128xf32>
    %119 = math.exp %118 : vector<8x128xf32>
    %120 = arith.subf %92, %117 : vector<8x128xf32>
    %121 = math.exp %120 : vector<8x128xf32>
    %122 = arith.mulf %119, %88 : vector<8x128xf32>
    %123 = arith.mulf %121, %94 : vector<8x128xf32>
    %124 = arith.addf %122, %123 : vector<8x128xf32>
    %125 = arith.mulf %119, %89 : vector<8x128xf32>
    %126 = arith.addf %125, %121 : vector<8x128xf32>
    %127 = vector.extract_strided_slice %71 {offsets = [1, 0, 0], sizes = [1, 8, 128], strides = [1, 1, 1]} : vector<8x8x128xf32> to vector<1x8x128xf32>
    %128 = vector.shape_cast %127 : vector<1x8x128xf32> to vector<8x128xf32>
    %129 = vector.extract_strided_slice %74 {offsets = [1, 0, 0], sizes = [1, 8, 128], strides = [1, 1, 1]} : vector<8x8x128xf32> to vector<1x8x128xf32>
    %130 = vector.shape_cast %129 : vector<1x8x128xf32> to vector<8x128xf32>
    %131 = vector.broadcast %87 : vector<1x128xf32> to vector<8x128xf32>
    %132 = arith.addf %131, %128 : vector<8x128xf32>
    %133 = arith.maximumf %117, %132 : vector<8x128xf32>
    %134 = arith.subf %117, %133 : vector<8x128xf32>
    %135 = math.exp %134 : vector<8x128xf32>
    %136 = arith.subf %132, %133 : vector<8x128xf32>
    %137 = math.exp %136 : vector<8x128xf32>
    %138 = arith.mulf %135, %124 : vector<8x128xf32>
    %139 = arith.mulf %137, %130 : vector<8x128xf32>
    %140 = arith.addf %138, %139 : vector<8x128xf32>
    %141 = arith.mulf %135, %126 : vector<8x128xf32>
    %142 = arith.addf %141, %137 : vector<8x128xf32>
    %143 = vector.extract_strided_slice %82 {offsets = [1, 0, 0], sizes = [1, 8, 128], strides = [1, 1, 1]} : vector<8x8x128xf32> to vector<1x8x128xf32>
    %144 = vector.shape_cast %143 : vector<1x8x128xf32> to vector<8x128xf32>
    %145 = arith.mulf %144, %140 : vector<8x128xf32>
    %146 = tpu.reciprocal %142 {approx = true} : vector<8x128xf32> -> vector<8x128xf32>
    %147 = arith.mulf %145, %146 : vector<8x128xf32>
    %c1 = arith.constant 1 : index
    %c0_46 = arith.constant 0 : index
    %c0_47 = arith.constant 0 : index
    %148 = vector.load %arg18[%c1, %c0_46, %c0_47] : memref<8x8x128xf32, #tpu.memory_space<vmem>>, vector<1x8x128xf32>
    %149 = vector.shape_cast %148 : vector<1x8x128xf32> to vector<8x128xf32>
    %150 = vector.shape_cast %147 : vector<8x128xf32> to vector<1x8x128xf32>
    tpu.vector_store %arg18[%c1, %c0_46, %c0_47], %150 {strides = array<i32>} : memref<8x8x128xf32, #tpu.memory_space<vmem>>, vector<1x8x128xf32>,
    %151 = vector.broadcast %86 : vector<1x128xf32> to vector<8x128xf32>
    %152 = arith.addf %117, %151 : vector<8x128xf32>
    %153 = arith.maximumf %152, %128 : vector<8x128xf32>
    %154 = arith.subf %152, %153 : vector<8x128xf32>
    %155 = math.exp %154 : vector<8x128xf32>
    %156 = arith.subf %128, %153 : vector<8x128xf32>
    %157 = math.exp %156 : vector<8x128xf32>
    %158 = arith.mulf %155, %124 : vector<8x128xf32>
    %159 = arith.mulf %157, %130 : vector<8x128xf32>
    %160 = arith.addf %158, %159 : vector<8x128xf32>
    %161 = arith.mulf %155, %126 : vector<8x128xf32>
    %162 = arith.addf %161, %157 : vector<8x128xf32>
    %163 = vector.extract_strided_slice %71 {offsets = [2, 0, 0], sizes = [1, 8, 128], strides = [1, 1, 1]} : vector<8x8x128xf32> to vector<1x8x128xf32>
    %164 = vector.shape_cast %163 : vector<1x8x128xf32> to vector<8x128xf32>
    %165 = vector.extract_strided_slice %74 {offsets = [2, 0, 0], sizes = [1, 8, 128], strides = [1, 1, 1]} : vector<8x8x128xf32> to vector<1x8x128xf32>
    %166 = vector.shape_cast %165 : vector<1x8x128xf32> to vector<8x128xf32>
    %167 = vector.broadcast %87 : vector<1x128xf32> to vector<8x128xf32>
    %168 = arith.addf %167, %164 : vector<8x128xf32>
    %169 = arith.maximumf %153, %168 : vector<8x128xf32>
    %170 = arith.subf %153, %169 : vector<8x128xf32>
    %171 = math.exp %170 : vector<8x128xf32>
    %172 = arith.subf %168, %169 : vector<8x128xf32>
    %173 = math.exp %172 : vector<8x128xf32>
    %174 = arith.mulf %171, %160 : vector<8x128xf32>
    %175 = arith.mulf %173, %166 : vector<8x128xf32>
    %176 = arith.addf %174, %175 : vector<8x128xf32>
    %177 = arith.mulf %171, %162 : vector<8x128xf32>
    %178 = arith.addf %177, %173 : vector<8x128xf32>
    %179 = vector.extract_strided_slice %82 {offsets = [2, 0, 0], sizes = [1, 8, 128], strides = [1, 1, 1]} : vector<8x8x128xf32> to vector<1x8x128xf32>
    %180 = vector.shape_cast %179 : vector<1x8x128xf32> to vector<8x128xf32>
    %181 = arith.mulf %180, %176 : vector<8x128xf32>
    %182 = tpu.reciprocal %178 {approx = true} : vector<8x128xf32> -> vector<8x128xf32>
    %183 = arith.mulf %181, %182 : vector<8x128xf32>
    %c2 = arith.constant 2 : index
    %c0_48 = arith.constant 0 : index
    %c0_49 = arith.constant 0 : index
    %184 = vector.load %arg18[%c2, %c0_48, %c0_49] : memref<8x8x128xf32, #tpu.memory_space<vmem>>, vector<1x8x128xf32>
    %185 = vector.shape_cast %184 : vector<1x8x128xf32> to vector<8x128xf32>
    %186 = vector.shape_cast %183 : vector<8x128xf32> to vector<1x8x128xf32>
    tpu.vector_store %arg18[%c2, %c0_48, %c0_49], %186 {strides = array<i32>} : memref<8x8x128xf32, #tpu.memory_space<vmem>>, vector<1x8x128xf32>,
    %187 = vector.broadcast %86 : vector<1x128xf32> to vector<8x128xf32>
    %188 = arith.addf %153, %187 : vector<8x128xf32>
    %189 = arith.maximumf %188, %164 : vector<8x128xf32>
    %190 = arith.subf %188, %189 : vector<8x128xf32>
    %191 = math.exp %190 : vector<8x128xf32>
    %192 = arith.subf %164, %189 : vector<8x128xf32>
    %193 = math.exp %192 : vector<8x128xf32>
    %194 = arith.mulf %191, %160 : vector<8x128xf32>
    %195 = arith.mulf %193, %166 : vector<8x128xf32>
    %196 = arith.addf %194, %195 : vector<8x128xf32>
    %197 = arith.mulf %191, %162 : vector<8x128xf32>
    %198 = arith.addf %197, %193 : vector<8x128xf32>
    %199 = vector.extract_strided_slice %71 {offsets = [3, 0, 0], sizes = [1, 8, 128], strides = [1, 1, 1]} : vector<8x8x128xf32> to vector<1x8x128xf32>
    %200 = vector.shape_cast %199 : vector<1x8x128xf32> to vector<8x128xf32>
    %201 = vector.extract_strided_slice %74 {offsets = [3, 0, 0], sizes = [1, 8, 128], strides = [1, 1, 1]} : vector<8x8x128xf32> to vector<1x8x128xf32>
    %202 = vector.shape_cast %201 : vector<1x8x128xf32> to vector<8x128xf32>
    %203 = vector.broadcast %87 : vector<1x128xf32> to vector<8x128xf32>
    %204 = arith.addf %203, %200 : vector<8x128xf32>
    %205 = arith.maximumf %189, %204 : vector<8x128xf32>
    %206 = arith.subf %189, %205 : vector<8x128xf32>
    %207 = math.exp %206 : vector<8x128xf32>
    %208 = arith.subf %204, %205 : vector<8x128xf32>
    %209 = math.exp %208 : vector<8x128xf32>
    %210 = arith.mulf %207, %196 : vector<8x128xf32>
    %211 = arith.mulf %209, %202 : vector<8x128xf32>
    %212 = arith.addf %210, %211 : vector<8x128xf32>
    %213 = arith.mulf %207, %198 : vector<8x128xf32>
    %214 = arith.addf %213, %209 : vector<8x128xf32>
    %215 = vector.extract_strided_slice %82 {offsets = [3, 0, 0], sizes = [1, 8, 128], strides = [1, 1, 1]} : vector<8x8x128xf32> to vector<1x8x128xf32>
    %216 = vector.shape_cast %215 : vector<1x8x128xf32> to vector<8x128xf32>
    %217 = arith.mulf %216, %212 : vector<8x128xf32>
    %218 = tpu.reciprocal %214 {approx = true} : vector<8x128xf32> -> vector<8x128xf32>
    %219 = arith.mulf %217, %218 : vector<8x128xf32>
    %c3 = arith.constant 3 : index
    %c0_50 = arith.constant 0 : index
    %c0_51 = arith.constant 0 : index
    %220 = vector.load %arg18[%c3, %c0_50, %c0_51] : memref<8x8x128xf32, #tpu.memory_space<vmem>>, vector<1x8x128xf32>
    %221 = vector.shape_cast %220 : vector<1x8x128xf32> to vector<8x128xf32>
    %222 = vector.shape_cast %219 : vector<8x128xf32> to vector<1x8x128xf32>
    tpu.vector_store %arg18[%c3, %c0_50, %c0_51], %222 {strides = array<i32>} : memref<8x8x128xf32, #tpu.memory_space<vmem>>, vector<1x8x128xf32>,
    %223 = vector.broadcast %86 : vector<1x128xf32> to vector<8x128xf32>
    %224 = arith.addf %189, %223 : vector<8x128xf32>
    %225 = arith.maximumf %224, %200 : vector<8x128xf32>
    %226 = arith.subf %224, %225 : vector<8x128xf32>
    %227 = math.exp %226 : vector<8x128xf32>
    %228 = arith.subf %200, %225 : vector<8x128xf32>
    %229 = math.exp %228 : vector<8x128xf32>
    %230 = arith.mulf %227, %196 : vector<8x128xf32>
    %231 = arith.mulf %229, %202 : vector<8x128xf32>
    %232 = arith.addf %230, %231 : vector<8x128xf32>
    %233 = arith.mulf %227, %198 : vector<8x128xf32>
    %234 = arith.addf %233, %229 : vector<8x128xf32>
    %235 = vector.extract_strided_slice %71 {offsets = [4, 0, 0], sizes = [1, 8, 128], strides = [1, 1, 1]} : vector<8x8x128xf32> to vector<1x8x128xf32>
    %236 = vector.shape_cast %235 : vector<1x8x128xf32> to vector<8x128xf32>
    %237 = vector.extract_strided_slice %74 {offsets = [4, 0, 0], sizes = [1, 8, 128], strides = [1, 1, 1]} : vector<8x8x128xf32> to vector<1x8x128xf32>
    %238 = vector.shape_cast %237 : vector<1x8x128xf32> to vector<8x128xf32>
    %239 = vector.broadcast %87 : vector<1x128xf32> to vector<8x128xf32>
    %240 = arith.addf %239, %236 : vector<8x128xf32>
    %241 = arith.maximumf %225, %240 : vector<8x128xf32>
    %242 = arith.subf %225, %241 : vector<8x128xf32>
    %243 = math.exp %242 : vector<8x128xf32>
    %244 = arith.subf %240, %241 : vector<8x128xf32>
    %245 = math.exp %244 : vector<8x128xf32>
    %246 = arith.mulf %243, %232 : vector<8x128xf32>
    %247 = arith.mulf %245, %238 : vector<8x128xf32>
    %248 = arith.addf %246, %247 : vector<8x128xf32>
    %249 = arith.mulf %243, %234 : vector<8x128xf32>
    %250 = arith.addf %249, %245 : vector<8x128xf32>
    %251 = vector.extract_strided_slice %82 {offsets = [4, 0, 0], sizes = [1, 8, 128], strides = [1, 1, 1]} : vector<8x8x128xf32> to vector<1x8x128xf32>
    %252 = vector.shape_cast %251 : vector<1x8x128xf32> to vector<8x128xf32>
    %253 = arith.mulf %252, %248 : vector<8x128xf32>
    %254 = tpu.reciprocal %250 {approx = true} : vector<8x128xf32> -> vector<8x128xf32>
    %255 = arith.mulf %253, %254 : vector<8x128xf32>
    %c4 = arith.constant 4 : index
    %c0_52 = arith.constant 0 : index
    %c0_53 = arith.constant 0 : index
    %256 = vector.load %arg18[%c4, %c0_52, %c0_53] : memref<8x8x128xf32, #tpu.memory_space<vmem>>, vector<1x8x128xf32>
    %257 = vector.shape_cast %256 : vector<1x8x128xf32> to vector<8x128xf32>
    %258 = vector.shape_cast %255 : vector<8x128xf32> to vector<1x8x128xf32>
    tpu.vector_store %arg18[%c4, %c0_52, %c0_53], %258 {strides = array<i32>} : memref<8x8x128xf32, #tpu.memory_space<vmem>>, vector<1x8x128xf32>,
    %259 = vector.broadcast %86 : vector<1x128xf32> to vector<8x128xf32>
    %260 = arith.addf %225, %259 : vector<8x128xf32>
    %261 = arith.maximumf %260, %236 : vector<8x128xf32>
    %262 = arith.subf %260, %261 : vector<8x128xf32>
    %263 = math.exp %262 : vector<8x128xf32>
    %264 = arith.subf %236, %261 : vector<8x128xf32>
    %265 = math.exp %264 : vector<8x128xf32>
    %266 = arith.mulf %263, %232 : vector<8x128xf32>
    %267 = arith.mulf %265, %238 : vector<8x128xf32>
    %268 = arith.addf %266, %267 : vector<8x128xf32>
    %269 = arith.mulf %263, %234 : vector<8x128xf32>
    %270 = arith.addf %269, %265 : vector<8x128xf32>
    %271 = vector.extract_strided_slice %71 {offsets = [5, 0, 0], sizes = [1, 8, 128], strides = [1, 1, 1]} : vector<8x8x128xf32> to vector<1x8x128xf32>
    %272 = vector.shape_cast %271 : vector<1x8x128xf32> to vector<8x128xf32>
    %273 = vector.extract_strided_slice %74 {offsets = [5, 0, 0], sizes = [1, 8, 128], strides = [1, 1, 1]} : vector<8x8x128xf32> to vector<1x8x128xf32>
    %274 = vector.shape_cast %273 : vector<1x8x128xf32> to vector<8x128xf32>
    %275 = vector.broadcast %87 : vector<1x128xf32> to vector<8x128xf32>
    %276 = arith.addf %275, %272 : vector<8x128xf32>
    %277 = arith.maximumf %261, %276 : vector<8x128xf32>
    %278 = arith.subf %261, %277 : vector<8x128xf32>
    %279 = math.exp %278 : vector<8x128xf32>
    %280 = arith.subf %276, %277 : vector<8x128xf32>
    %281 = math.exp %280 : vector<8x128xf32>
    %282 = arith.mulf %279, %268 : vector<8x128xf32>
    %283 = arith.mulf %281, %274 : vector<8x128xf32>
    %284 = arith.addf %282, %283 : vector<8x128xf32>
    %285 = arith.mulf %279, %270 : vector<8x128xf32>
    %286 = arith.addf %285, %281 : vector<8x128xf32>
    %287 = vector.extract_strided_slice %82 {offsets = [5, 0, 0], sizes = [1, 8, 128], strides = [1, 1, 1]} : vector<8x8x128xf32> to vector<1x8x128xf32>
    %288 = vector.shape_cast %287 : vector<1x8x128xf32> to vector<8x128xf32>
    %289 = arith.mulf %288, %284 : vector<8x128xf32>
    %290 = tpu.reciprocal %286 {approx = true} : vector<8x128xf32> -> vector<8x128xf32>
    %291 = arith.mulf %289, %290 : vector<8x128xf32>
    %c5 = arith.constant 5 : index
    %c0_54 = arith.constant 0 : index
    %c0_55 = arith.constant 0 : index
    %292 = vector.load %arg18[%c5, %c0_54, %c0_55] : memref<8x8x128xf32, #tpu.memory_space<vmem>>, vector<1x8x128xf32>
    %293 = vector.shape_cast %292 : vector<1x8x128xf32> to vector<8x128xf32>
    %294 = vector.shape_cast %291 : vector<8x128xf32> to vector<1x8x128xf32>
    tpu.vector_store %arg18[%c5, %c0_54, %c0_55], %294 {strides = array<i32>} : memref<8x8x128xf32, #tpu.memory_space<vmem>>, vector<1x8x128xf32>,
    %295 = vector.broadcast %86 : vector<1x128xf32> to vector<8x128xf32>
    %296 = arith.addf %261, %295 : vector<8x128xf32>
    %297 = arith.maximumf %296, %272 : vector<8x128xf32>
    %298 = arith.subf %296, %297 : vector<8x128xf32>
    %299 = math.exp %298 : vector<8x128xf32>
    %300 = arith.subf %272, %297 : vector<8x128xf32>
    %301 = math.exp %300 : vector<8x128xf32>
    %302 = arith.mulf %299, %268 : vector<8x128xf32>
    %303 = arith.mulf %301, %274 : vector<8x128xf32>
    %304 = arith.addf %302, %303 : vector<8x128xf32>
    %305 = arith.mulf %299, %270 : vector<8x128xf32>
    %306 = arith.addf %305, %301 : vector<8x128xf32>
    %307 = vector.extract_strided_slice %71 {offsets = [6, 0, 0], sizes = [1, 8, 128], strides = [1, 1, 1]} : vector<8x8x128xf32> to vector<1x8x128xf32>
    %308 = vector.shape_cast %307 : vector<1x8x128xf32> to vector<8x128xf32>
    %309 = vector.extract_strided_slice %74 {offsets = [6, 0, 0], sizes = [1, 8, 128], strides = [1, 1, 1]} : vector<8x8x128xf32> to vector<1x8x128xf32>
    %310 = vector.shape_cast %309 : vector<1x8x128xf32> to vector<8x128xf32>
    %311 = vector.broadcast %87 : vector<1x128xf32> to vector<8x128xf32>
    %312 = arith.addf %311, %308 : vector<8x128xf32>
    %313 = arith.maximumf %297, %312 : vector<8x128xf32>
    %314 = arith.subf %297, %313 : vector<8x128xf32>
    %315 = math.exp %314 : vector<8x128xf32>
    %316 = arith.subf %312, %313 : vector<8x128xf32>
    %317 = math.exp %316 : vector<8x128xf32>
    %318 = arith.mulf %315, %304 : vector<8x128xf32>
    %319 = arith.mulf %317, %310 : vector<8x128xf32>
    %320 = arith.addf %318, %319 : vector<8x128xf32>
    %321 = arith.mulf %315, %306 : vector<8x128xf32>
    %322 = arith.addf %321, %317 : vector<8x128xf32>
    %323 = vector.extract_strided_slice %82 {offsets = [6, 0, 0], sizes = [1, 8, 128], strides = [1, 1, 1]} : vector<8x8x128xf32> to vector<1x8x128xf32>
    %324 = vector.shape_cast %323 : vector<1x8x128xf32> to vector<8x128xf32>
    %325 = arith.mulf %324, %320 : vector<8x128xf32>
    %326 = tpu.reciprocal %322 {approx = true} : vector<8x128xf32> -> vector<8x128xf32>
    %327 = arith.mulf %325, %326 : vector<8x128xf32>
    %c6 = arith.constant 6 : index
    %c0_56 = arith.constant 0 : index
    %c0_57 = arith.constant 0 : index
    %328 = vector.load %arg18[%c6, %c0_56, %c0_57] : memref<8x8x128xf32, #tpu.memory_space<vmem>>, vector<1x8x128xf32>
    %329 = vector.shape_cast %328 : vector<1x8x128xf32> to vector<8x128xf32>
    %330 = vector.shape_cast %327 : vector<8x128xf32> to vector<1x8x128xf32>
    tpu.vector_store %arg18[%c6, %c0_56, %c0_57], %330 {strides = array<i32>} : memref<8x8x128xf32, #tpu.memory_space<vmem>>, vector<1x8x128xf32>,
    %331 = vector.broadcast %86 : vector<1x128xf32> to vector<8x128xf32>
    %332 = arith.addf %297, %331 : vector<8x128xf32>
    %333 = arith.maximumf %332, %308 : vector<8x128xf32>
    %334 = arith.subf %332, %333 : vector<8x128xf32>
    %335 = math.exp %334 : vector<8x128xf32>
    %336 = arith.subf %308, %333 : vector<8x128xf32>
    %337 = math.exp %336 : vector<8x128xf32>
    %338 = arith.mulf %335, %304 : vector<8x128xf32>
    %339 = arith.mulf %337, %310 : vector<8x128xf32>
    %340 = arith.addf %338, %339 : vector<8x128xf32>
    %341 = arith.mulf %335, %306 : vector<8x128xf32>
    %342 = arith.addf %341, %337 : vector<8x128xf32>
    %343 = vector.extract_strided_slice %71 {offsets = [7, 0, 0], sizes = [1, 8, 128], strides = [1, 1, 1]} : vector<8x8x128xf32> to vector<1x8x128xf32>
    %344 = vector.shape_cast %343 : vector<1x8x128xf32> to vector<8x128xf32>
    %345 = vector.extract_strided_slice %74 {offsets = [7, 0, 0], sizes = [1, 8, 128], strides = [1, 1, 1]} : vector<8x8x128xf32> to vector<1x8x128xf32>
    %346 = vector.shape_cast %345 : vector<1x8x128xf32> to vector<8x128xf32>
    %347 = vector.broadcast %87 : vector<1x128xf32> to vector<8x128xf32>
    %348 = arith.addf %347, %344 : vector<8x128xf32>
    %349 = arith.maximumf %333, %348 : vector<8x128xf32>
    %350 = arith.subf %333, %349 : vector<8x128xf32>
    %351 = math.exp %350 : vector<8x128xf32>
    %352 = arith.subf %348, %349 : vector<8x128xf32>
    %353 = math.exp %352 : vector<8x128xf32>
    %354 = arith.mulf %351, %340 : vector<8x128xf32>
    %355 = arith.mulf %353, %346 : vector<8x128xf32>
    %356 = arith.addf %354, %355 : vector<8x128xf32>
    %357 = arith.mulf %351, %342 : vector<8x128xf32>
    %358 = arith.addf %357, %353 : vector<8x128xf32>
    %359 = vector.extract_strided_slice %82 {offsets = [7, 0, 0], sizes = [1, 8, 128], strides = [1, 1, 1]} : vector<8x8x128xf32> to vector<1x8x128xf32>
    %360 = vector.shape_cast %359 : vector<1x8x128xf32> to vector<8x128xf32>
    %361 = arith.mulf %360, %356 : vector<8x128xf32>
    %362 = tpu.reciprocal %358 {approx = true} : vector<8x128xf32> -> vector<8x128xf32>
    %363 = arith.mulf %361, %362 : vector<8x128xf32>
    %c7 = arith.constant 7 : index
    %c0_58 = arith.constant 0 : index
    %c0_59 = arith.constant 0 : index
    %364 = vector.load %arg18[%c7, %c0_58, %c0_59] : memref<8x8x128xf32, #tpu.memory_space<vmem>>, vector<1x8x128xf32>
    %365 = vector.shape_cast %364 : vector<1x8x128xf32> to vector<8x128xf32>
    %366 = vector.shape_cast %363 : vector<8x128xf32> to vector<1x8x128xf32>
    tpu.vector_store %arg18[%c7, %c0_58, %c0_59], %366 {strides = array<i32>} : memref<8x8x128xf32, #tpu.memory_space<vmem>>, vector<1x8x128xf32>,
    %c0_60 = arith.constant 0 : index
    %c0_61 = arith.constant 0 : index
    %c0_62 = arith.constant 0 : index
    %367 = vector.load %arg18[%c0_60, %c0_61, %c0_62] : memref<8x8x128xf32, #tpu.memory_space<vmem>>, vector<8x8x128xf32>
    %368 = arith.truncf %367 : vector<8x8x128xf32> to vector<8x8x128xbf16>
    %369 = vector.shape_cast %368 : vector<8x8x128xbf16> to vector<64x128xbf16>
    %c0_63 = arith.constant 0 : index
    %c0_64 = arith.constant 0 : index
    %370 = vector.load %arg12[%c0_63, %c0_64] : memref<128x128xbf16, #tpu.memory_space<vmem>>, vector<128x128xbf16>
    %cst_65 = arith.constant dense<0.000000e+00> : vector<64x128xf32>
    %371 = tpu.matmul %369, %370, %cst_65 {dimension_numbers = #tpu.dot_dimension_numbers<[1], [0], [0], [1], [0, 0, 1, 1], [], []>} : vector<64x128xbf16>, vector<128x128xbf16>, vector<64x128xf32> -> vector<64x128xf32>
    %372 = vector.shape_cast %29 : vector<8x8x128xf32> to vector<64x128xf32>
    %373 = arith.addf %371, %372 : vector<64x128xf32>
    %374 = arith.truncf %373 : vector<64x128xf32> to vector<64x128xbf16>
    %c0_66 = arith.constant 0 : index
    %c0_67 = arith.constant 0 : index
    %375 = vector.load %arg15[%c0_66, %c0_67] : memref<128x128xbf16, #tpu.memory_space<vmem>>, vector<128x128xbf16>
    %cst_68 = arith.constant dense<0.000000e+00> : vector<64x128xf32>
    %376 = tpu.matmul %374, %375, %cst_68 {dimension_numbers = #tpu.dot_dimension_numbers<[1], [0], [0], [1], [0, 0, 1, 1], [], []>} : vector<64x128xbf16>, vector<128x128xbf16>, vector<64x128xf32> -> vector<64x128xf32>
    %c0_69 = arith.constant 0 : index
    %c0_70 = arith.constant 0 : index
    %377 = vector.load %arg16[%c0_69, %c0_70] : memref<1x128xf32, #tpu.memory_space<vmem>>, vector<1x128xf32>
    %378 = vector.broadcast %377 : vector<1x128xf32> to vector<64x128xf32>
    %379 = arith.addf %376, %378 : vector<64x128xf32>
    %380 = vector.shape_cast %379 : vector<64x128xf32> to vector<8x8x128xf32>
    %c0_71 = arith.constant 0 : index
    %c0_72 = arith.constant 0 : index
    %c0_73 = arith.constant 0 : index
    %381 = vector.load %arg17[%c0_71, %c0_72, %c0_73] : memref<8x8x128xf32, #tpu.memory_space<vmem>>, vector<8x8x128xf32>
    tpu.vector_store %arg17[%c0_71, %c0_72, %c0_73], %380 {strides = array<i32>} : memref<8x8x128xf32, #tpu.memory_space<vmem>>, vector<8x8x128xf32>,
    return
  }
  func.func @transform_0(%arg0: i32) -> (i32, i32, i32) {
    %c0_i32 = arith.constant 0 : i32
    %c0_i32_0 = arith.constant 0 : i32
    %c0_i32_1 = arith.constant 0 : i32
    return %c0_i32, %arg0, %c0_i32_0 : i32, i32, i32
  }
  func.func @transform_1(%arg0: i32) -> (i32, i32) {
    %c0_i32 = arith.constant 0 : i32
    %c0_i32_0 = arith.constant 0 : i32
    return %arg0, %c0_i32 : i32, i32
  }
  func.func @transform_2(%arg0: i32) -> (i32, i32) {
    %c0_i32 = arith.constant 0 : i32
    %c0_i32_0 = arith.constant 0 : i32
    %c0_i32_1 = arith.constant 0 : i32
    return %c0_i32, %c0_i32_0 : i32, i32
  }
  func.func @transform_3(%arg0: i32) -> (i32, i32) {
    %c0_i32 = arith.constant 0 : i32
    %c0_i32_0 = arith.constant 0 : i32
    %c0_i32_1 = arith.constant 0 : i32
    return %c0_i32, %c0_i32_0 : i32, i32
  }
  func.func @transform_4(%arg0: i32) -> (i32, i32) {
    %c0_i32 = arith.constant 0 : i32
    %c0_i32_0 = arith.constant 0 : i32
    %c0_i32_1 = arith.constant 0 : i32
    return %c0_i32, %c0_i32_0 : i32, i32
  }
  func.func @transform_5(%arg0: i32) -> (i32, i32) {
    %c0_i32 = arith.constant 0 : i32
    %c0_i32_0 = arith.constant 0 : i32
    %c0_i32_1 = arith.constant 0 : i32
    return %c0_i32, %c0_i32_0 : i32, i32
  }
  func.func @transform_6(%arg0: i32) -> (i32, i32) {
    %c0_i32 = arith.constant 0 : i32
    %c0_i32_0 = arith.constant 0 : i32
    %c0_i32_1 = arith.constant 0 : i32
    return %c0_i32, %c0_i32_0 : i32, i32
  }
  func.func @transform_7(%arg0: i32) -> (i32, i32) {
    %c0_i32 = arith.constant 0 : i32
    %c0_i32_0 = arith.constant 0 : i32
    %c0_i32_1 = arith.constant 0 : i32
    return %c0_i32, %c0_i32_0 : i32, i32
  }
  func.func @transform_8(%arg0: i32) -> (i32, i32) {
    %c0_i32 = arith.constant 0 : i32
    %c0_i32_0 = arith.constant 0 : i32
    %c0_i32_1 = arith.constant 0 : i32
    return %c0_i32, %c0_i32_0 : i32, i32
  }
  func.func @transform_9(%arg0: i32) -> (i32, i32) {
    %c0_i32 = arith.constant 0 : i32
    %c0_i32_0 = arith.constant 0 : i32
    %c0_i32_1 = arith.constant 0 : i32
    return %c0_i32, %c0_i32_0 : i32, i32
  }
  func.func @transform_10(%arg0: i32) -> (i32, i32) {
    %c0_i32 = arith.constant 0 : i32
    %c0_i32_0 = arith.constant 0 : i32
    %c0_i32_1 = arith.constant 0 : i32
    return %c0_i32, %c0_i32_0 : i32, i32
  }
  func.func @transform_11(%arg0: i32) -> (i32, i32) {
    %c0_i32 = arith.constant 0 : i32
    %c0_i32_0 = arith.constant 0 : i32
    %c0_i32_1 = arith.constant 0 : i32
    return %c0_i32, %c0_i32_0 : i32, i32
  }
  func.func @transform_12(%arg0: i32) -> (i32, i32) {
    %c0_i32 = arith.constant 0 : i32
    %c0_i32_0 = arith.constant 0 : i32
    %c0_i32_1 = arith.constant 0 : i32
    return %c0_i32, %c0_i32_0 : i32, i32
  }
  func.func @transform_13(%arg0: i32) -> (i32, i32) {
    %c0_i32 = arith.constant 0 : i32
    %c0_i32_0 = arith.constant 0 : i32
    %c0_i32_1 = arith.constant 0 : i32
    return %c0_i32, %c0_i32_0 : i32, i32
  }
  func.func @transform_14(%arg0: i32) -> (i32, i32) {
    %c0_i32 = arith.constant 0 : i32
    %c0_i32_0 = arith.constant 0 : i32
    %c0_i32_1 = arith.constant 0 : i32
    return %c0_i32, %c0_i32_0 : i32, i32
  }
  func.func @transform_15(%arg0: i32) -> (i32, i32) {
    %c0_i32 = arith.constant 0 : i32
    %c0_i32_0 = arith.constant 0 : i32
    %c0_i32_1 = arith.constant 0 : i32
    return %c0_i32, %c0_i32_0 : i32, i32
  }
  func.func @transform_16(%arg0: i32) -> (i32, i32, i32) {
    %c0_i32 = arith.constant 0 : i32
    %c0_i32_0 = arith.constant 0 : i32
    %c0_i32_1 = arith.constant 0 : i32
    return %c0_i32, %arg0, %c0_i32_0 : i32, i32, i32
  }
}

</mosaic_0001>

<bundles_post_ra>
// kernel: omniarch_rwkv_forward.1
= control target key start
LH: loop header
LB: loop body
LE: loop exit
PB: predicated region body
PF: predicated region fallthrough
CT: control target
= control target key end

     0   :  { %vm98_vm0 = vcmask 130048   ;;  %s2641_s2 = inlined_call_operand.vmem [shape: bf16[16,128], index: 2, kind: input, shape index: {}]   ;;  %s2642_s3 = inlined_call_operand.vmem [shape: bf16[16,128], index: 3, kind: input, shape index: {}]   ;;  %s2643_s0 = inlined_call_operand.vmem [shape: f32[8,8,16], index: 0, kind: input, shape index: {}]   ;;  %s2644_s1 = inlined_call_operand.vmem [shape: f32[8,16], index: 1, kind: input, shape index: {}]   ;;  %s2645_s4 = inlined_call_operand.vmem [shape: f32[1,128], index: 4, kind: input, shape index: {}]   ;;  %s2646_s8 = inlined_call_operand.vmem [shape: bf16[128,128], index: 8, kind: input, shape index: {}]   ;;  %s2647_s10 = inlined_call_operand.vmem [shape: bf16[128,128], index: 10, kind: input, shape index: {}]   ;;  %s2648_s5 = inlined_call_operand.vmem [shape: f32[1,128], index: 5, kind: input, shape index: {}]   ;;  %s2649_s7 = inlined_call_operand.vmem [shape: f32[1,128], index: 7, kind: input, shape index: {}]   ;;  %s2650_s9 = inlined_call_operand.vmem [shape: bf16[128,128], index: 9, kind: input, shape index: {}]   ;;  %s2651_s13 = inlined_call_operand.vmem [shape: f32[1,128], index: 13, kind: input, shape index: {}]   ;;  %s2652_s6 = inlined_call_operand.vmem [shape: f32[1,128], index: 6, kind: input, shape index: {}]   ;;  %s2653_s12 = inlined_call_operand.vmem [shape: f32[1,128], index: 12, kind: input, shape index: {}]   ;;  %s2654_s11 = inlined_call_operand.vmem [shape: bf16[128,128], index: 11, kind: input, shape index: {}]   ;;  %s2655_s14 = inlined_call_operand.vmem [shape: bf16[128,128], index: 14, kind: input, shape index: {}]   ;;  %s2656_s15 = inlined_call_operand.vmem [shape: f32[1,128], index: 15, kind: input, shape index: {}]   ;;  %s2657_s16 = inlined_call_operand.vmem [shape: f32[8,8,128], index: 16, kind: output, shape index: {}]  }
   0x1   :  { %2658 = sst [smem:[#allocation3_spill]] %s2641_s2  ;;  %v1552_v1 = vld [vmem:[%s2642_s3] sm:$0xff]  ;;  %v55_v3 = vld [vmem:[%s2643_s0 + $0x8] sm:$0xff]  ;;  %v56_v11 = vld [vmem:[%s2643_s0 + $0x10] sm:$0xff] }
   0x2   :  { %s2659_s23 = sld [smem:[#allocation3_spill]]  ;;  %v54_v2 = vld [vmem:[%s2643_s0] sm:$0xff]  ;;  %160 = vmatpush.bf16.msra.mxu1 %v1552_v1  ;;  %v63_v6 = vpack.c.bf16 %v55_v3, %v55_v3  ;;  %v57_v12 = vld [vmem:[%s2643_s0 + $0x18] sm:$0xff]  ;;  %v64_v13 = vpack.c.bf16 %v56_v11, %v56_v11  ;;  %v59_v19 = vld [vmem:[%s2643_s0 + $0x28] sm:$0xff] }
   0x3   :  { %v62_v4 = vpack.c.bf16 %v54_v2, %v54_v2  ;;  %v140_v5 = vld [vmem:[%s2644_s1] sm:$0xff]  ;;  %v65_v14 = vpack.c.bf16 %v57_v12, %v57_v12  ;;  %v67_v21 = vpack.c.bf16 %v59_v19, %v59_v19  ;;  %v60_v25 = vld [vmem:[%s2643_s0 + $0x30] sm:$0xff]  ;;  %v61_v26 = vld [vmem:[%s2643_s0 + $0x38] sm:$0xff] }
   0x4   :  { %v141_v7 = vpack.c.bf16 %v140_v5, %v140_v5  ;;  %v81_v9 = vunpack.c.l.b16 %v63_v6  ;;  %v82_v15 = vunpack.c.l.b16 %v64_v13  ;;  %v58_v18 = vld [vmem:[%s2643_s0 + $0x20] sm:$0xff]  ;;  %v68_v27 = vpack.c.bf16 %v60_v25, %v60_v25  ;;  %v1560_v32 = vld [vmem:[%s2646_s8 + $0x38] sm:$0xff]  ;;  %v1559_v34 = vld [vmem:[%s2646_s8 + $0x30] sm:$0xff] }
   0x5   :  { %v80_v8 = vunpack.c.l.b16 %v62_v4  ;;  %v83_v16 = vunpack.c.l.b16 %v65_v14  ;;  %v66_v20 = vpack.c.bf16 %v58_v18, %v58_v18  ;;  %v85_v23 = vunpack.c.l.b16 %v67_v21  ;;  %v1576_v33 = vld [vmem:[%s2647_s10 + $0x38] sm:$0xff]  ;;  %466 = vmatpush.bf16.msra.mxu2 %v1560_v32  ;;  %1593 = vmatpush.bf16.msra.mxu3 %v1560_v32  ;;  %v1575_v35 = vld [vmem:[%s2647_s10 + $0x30] sm:$0xff]  ;;  %v1558_v36 = vld [vmem:[%s2646_s8 + $0x28] sm:$0xff] }
   0x6   :  { %1382 = vmatmul.msk.bf16.vlgmr.msra.gmra.mxu1 %vm98_vm0, %v141_v7  ;;  %v69_v28 = vpack.c.bf16 %v61_v26, %v61_v26  ;;  %v86_v29 = vunpack.c.l.b16 %v68_v27  ;;  %v1574_v37 = vld [vmem:[%s2647_s10 + $0x28] sm:$0xff]  ;;  %v1557_v38 = vld [vmem:[%s2646_s8 + $0x20] sm:$0xff]  ;;  %v1556_v41 = vld [vmem:[%s2646_s8 + $0x18] sm:$0xff] }
   0x7   :  { %v88_v10 = vpack.c.b16 %v81_v9, %v80_v8  ;;  %v89_v17 = vpack.c.b16 %v83_v16, %v82_v15  ;;  %v84_v22 = vunpack.c.l.b16 %v66_v20  ;;  %700 = vmatpush.bf16.msrb.mxu1 %v1576_v33  ;;  %v1573_v39 = vld [vmem:[%s2647_s10 + $0x20] sm:$0xff]  ;;  %v1572_v42 = vld [vmem:[%s2647_s10 + $0x18] sm:$0xff]  ;;  %v1555_v46 = vld [vmem:[%s2646_s8 + $0x10] sm:$0xff] }
   0x8   :  { %v1551_v0 = vld [vmem:[%s2659_s23] sm:$0xff]  ;;  %v87_v30 = vunpack.c.l.b16 %v69_v28  ;;  %v1571_v47 = vld [vmem:[%s2647_s10 + $0x10] sm:$0xff]  ;;  %v1554_v50 = vld [vmem:[%s2646_s8 + $0x8] sm:$0xff] }
   0x9   :  { %118 = vmatpush.bf16.msra.mxu0 %v1551_v0  ;;  %v90_v24 = vpack.c.b16 %v85_v23, %v84_v22  ;;  %467 = vmatpush.bf16.msra.mxu2 %v1559_v34  ;;  %v1891_v43 = vld [vmem:[%s2645_s4] ss:$0 sm:$0xff]  ;;  %v1570_v51 = vld [vmem:[%s2647_s10 + $0x8] sm:$0xff] }
   0xa   :  { %v91_v31 = vpack.c.b16 %v87_v30, %v86_v29  ;;  %1594 = vmatpush.bf16.msra.mxu3 %v1559_v34  ;;  %v1553_v57 = vld [vmem:[%s2646_s8] sm:$0xff] }
   0xb   :  { %701 = vmatpush.bf16.msrb.mxu1 %v1575_v35  ;;  %v1569_v58 = vld [vmem:[%s2647_s10] sm:$0xff] }
   0xc   :  { %1374 = vmatmul.msk.bf16.vlgmr.msra.gmra.mxu0 %vm98_vm0, %v88_v10  ;;  %v258_v3 = vld [vmem:[%s2648_s5] sm:$0x1] }
   0xd   :  { %468 = vmatpush.bf16.msra.mxu2 %v1558_v36  ;;  %v260_v6 = vld [vmem:[%s2649_s7] sm:$0x1]  ;;  %v272_v10 = vsub.f32 1.0, %v258_v3 }
   0xe   :  { %1595 = vmatpush.bf16.msra.mxu3 %v1558_v36  ;;  %v350_v12 = vsub.f32 1.0, %v260_v6  ;;  %v1927_v18 = vld [vmem:[%s2648_s5] ss:$0 sm:$0xff] }
   0xf   :  { %702 = vmatpush.bf16.msrb.mxu1 %v1574_v37  ;;  %v1929_v19 = vperm.slane %v272_v10, 0  ;;  %v1936_v21 = vld [vmem:[%s2649_s7] ss:$0 sm:$0xff] }
  0x10   :  { %v1938_v22 = vperm.slane %v350_v12, 0 }
  0x11   :  { %469 = vmatpush.bf16.msra.mxu2 %v1557_v38  ;;  %v276_v29 = vmul.f32 0.0, %v1929_v19 }
  0x12   :  { %1596 = vmatpush.bf16.msra.mxu3 %v1557_v38  ;;  %v354_v32 = vmul.f32 0.0, %v1938_v22 }
  0x13   :  { %703 = vmatpush.bf16.msrb.mxu1 %v1573_v39 }
  0x15   :  { %470 = vmatpush.bf16.msra.mxu2 %v1556_v41 }
  0x16   :  { %1597 = vmatpush.bf16.msra.mxu3 %v1556_v41 }
  0x17   :  { %704 = vmatpush.bf16.msrb.mxu1 %v1572_v42 }
  0x19   :  { %471 = vmatpush.bf16.msra.mxu2 %v1555_v46 }
  0x1a   :  { %1598 = vmatpush.bf16.msra.mxu3 %v1555_v46 }
  0x1b   :  { %705 = vmatpush.bf16.msrb.mxu1 %v1571_v47 }
  0x1c   :  { %1375 = vmatmul.msk.bf16.gmra.mxu0 %vm98_vm0, %v89_v17 }
  0x1d   :  { %472 = vmatpush.bf16.msra.mxu2 %v1554_v50 }
  0x1e   :  { %1599 = vmatpush.bf16.msra.mxu3 %v1554_v50 }
  0x1f   :  { %706 = vmatpush.bf16.msrb.mxu1 %v1570_v51 }
  0x21   :  { %473 = vmatpush.bf16.msra.mxu2 %v1553_v57 }
  0x22   :  { %1600 = vmatpush.bf16.msra.mxu3 %v1553_v57 }
  0x23   :  { %707 = vmatpush.bf16.msrb.mxu1 %v1569_v58 }
  0x2c   :  { %1376 = vmatmul.msk.bf16.gmra.mxu0 %vm98_vm0, %v90_v24 }
  0x3c   :  { %1377 = vmatmul.msk.bf16.gmra.mxu0 %vm98_vm0, %v91_v31 }
  0x83   :  { %v1880_v40 = vpop.f32.mrf.mxu1 }
  0x89   :  { %v120_v44 = vpop.f32.mrf.mxu0 }
  0x8a   :  { %v166_v45 = vadd.f32 %v1880_v40, %v120_v44 }
  0x8b   :  { %v164_v52 = vpop.f32.mrf.mxu1 }
  0x8c   :  { %v178_v48 = vadd.f32 %v1891_v43, %v166_v45 }
  0x8e   :  { %v186_v49 = vmul.f32 %v178_v48, %v178_v48 }
  0x90   :  { %v194_v53 = vmul.f32 %v186_v49, %v178_v48 }
  0x91   :  { %v122_v54 = vpop.f32.mrf.mxu0 }
  0x92   :  { %v202_v55 = vmul.f32 0.044715, %v194_v53  ;;  %v167_v56 = vadd.f32 %v1880_v40, %v122_v54 }
  0x94   :  { %v210_v59 = vadd.f32 %v202_v55, %v178_v48  ;;  %v179_v60 = vadd.f32 %v1891_v43, %v167_v56 }
  0x96   :  { %v218_v61 = vmul.f32 0.7978846, %v210_v59  ;;  %v187_v62 = vmul.f32 %v179_v60, %v179_v60 }
  0x98   :  { %1607 = vtanh.f32 %v218_v61  ;;  %v195_v63 = vmul.f32 %v187_v62, %v179_v60 }
  0x99   :  { %v125_v0 = vpop.f32.mrf.mxu0 }
  0x9a   :  { %v203_v1 = vmul.f32 0.044715, %v195_v63  ;;  %v168_v2 = vadd.f32 %v1880_v40, %v125_v0 }
  0x9c   :  { %v211_v4 = vadd.f32 %v203_v1, %v179_v60  ;;  %v180_v5 = vadd.f32 %v1891_v43, %v168_v2 }
  0x9e   :  { %v1608_v7 = vpop.eup %1607  ;;  %v219_v8 = vmul.f32 0.7978846, %v211_v4  ;;  %v188_v9 = vmul.f32 %v180_v5, %v180_v5 }
  0x9f   :  { %v234_v11 = vadd.f32 1.0, %v1608_v7 }
  0xa0   :  { %1609 = vtanh.f32 %v219_v8  ;;  %v196_v13 = vmul.f32 %v188_v9, %v180_v5 }
  0xa1   :  { %v242_v14 = vmul.f32 0.5, %v234_v11  ;;  %v127_v15 = vpop.f32.mrf.mxu0 }
  0xa2   :  { %v204_v16 = vmul.f32 0.044715, %v196_v13  ;;  %v169_v17 = vadd.f32 %v1880_v40, %v127_v15  ;;  %v1568_v15 = vld [vmem:[%s2650_s9 + $0x38] sm:$0xff] }
  0xa3   :  { %v1931_v20 = vmul.f32 %v242_v14, %v178_v48  ;;  %583 = vmatpush.bf16.msrb.mxu3 %v1568_v15 }
  0xa4   :  { %v212_v23 = vadd.f32 %v204_v16, %v180_v5  ;;  %v1941_v24 = vadd.f32 %v1891_v43, %v169_v17 }
  0xa5   :  { %v264_v28 = vmul.f32 %v1927_v18, %v1931_v20  ;;  %v342_v31 = vmul.f32 %v1936_v21, %v1931_v20  ;;  %v277_v46 = vmul.f32 %v1929_v19, %v1931_v20  ;;  %v355_v48 = vmul.f32 %v1938_v22, %v1931_v20 }
  0xa6   :  { %v1610_v25 = vpop.eup %1609  ;;  %v220_v26 = vmul.f32 0.7978846, %v212_v23  ;;  %v189_v27 = vmul.f32 %v1941_v24, %v1941_v24 }
  0xa7   :  { %v235_v30 = vadd.f32 1.0, %v1610_v25  ;;  %v284_v38 = vadd.f32 %v276_v29, %v264_v28  ;;  %v362_v41 = vadd.f32 %v354_v32, %v342_v31  ;;  %v1567_v32 = vld [vmem:[%s2650_s9 + $0x30] sm:$0xff] }
  0xa8   :  { %1611 = vtanh.f32 %v220_v26  ;;  %v197_v33 = vmul.f32 %v189_v27, %v1941_v24  ;;  %584 = vmatpush.bf16.msrb.mxu3 %v1567_v32 }
  0xa9   :  { %v243_v34 = vmul.f32 0.5, %v235_v30  ;;  %v130_v35 = vpop.f32.mrf.mxu0  ;;  %v292_v52 = vpack.c.bf16 %v284_v38, %v284_v38  ;;  %v370_v56 = vpack.c.bf16 %v362_v41, %v362_v41  ;;  %v1566_v38 = vld [vmem:[%s2650_s9 + $0x28] sm:$0xff] }
  0xaa   :  { %v205_v36 = vmul.f32 0.044715, %v197_v33  ;;  %v170_v37 = vadd.f32 %v1880_v40, %v130_v35 }
  0xab   :  { %v1953_v39 = vmul.f32 %v243_v34, %v179_v60  ;;  %v402_v0 = vunpack.c.l.b16 %v292_v52  ;;  %v636_v3 = vunpack.c.l.b16 %v370_v56  ;;  %v1565_v56 = vld [vmem:[%s2650_s9 + $0x20] sm:$0xff] }
  0xac   :  { %v213_v42 = vadd.f32 %v205_v36, %v1941_v24  ;;  %v1957_v44 = vadd.f32 %v1891_v43, %v170_v37  ;;  %585 = vmatpush.bf16.msrb.mxu3 %v1566_v38 }
  0xad   :  { %v265_v45 = vmul.f32 %v1927_v18, %v1953_v39  ;;  %v343_v47 = vmul.f32 %v1936_v21, %v1953_v39  ;;  %v278_v17 = vmul.f32 %v1929_v19, %v1953_v39  ;;  %v356_v26 = vmul.f32 %v1938_v22, %v1953_v39 }
  0xae   :  { %v1612_v49 = vpop.eup %1611  ;;  %v221_v50 = vmul.f32 0.7978846, %v213_v42  ;;  %v190_v51 = vmul.f32 %v1957_v44, %v1957_v44 }
  0xaf   :  { %v236_v53 = vadd.f32 1.0, %v1612_v49  ;;  %v285_v54 = vadd.f32 %v277_v46, %v265_v45  ;;  %v363_v55 = vadd.f32 %v355_v48, %v343_v47 }
  0xb0   :  { %1613 = vtanh.f32 %v221_v50  ;;  %v198_v57 = vmul.f32 %v190_v51, %v1957_v44  ;;  %586 = vmatpush.bf16.msrb.mxu3 %v1565_v56 }
  0xb1   :  { %v244_v58 = vmul.f32 0.5, %v236_v53  ;;  %v132_v59 = vpop.f32.mrf.mxu0  ;;  %v293_v60 = vpack.c.bf16 %v285_v54, %v285_v54  ;;  %v371_v61 = vpack.c.bf16 %v363_v55, %v363_v55 }
  0xb2   :  { %v206_v62 = vmul.f32 0.044715, %v198_v57  ;;  %v171_v63 = vadd.f32 %v1880_v40, %v132_v59 }
  0xb3   :  { %v1971_v1 = vmul.f32 %v244_v58, %v180_v5  ;;  %v403_v2 = vunpack.c.l.b16 %v293_v60  ;;  %v637_v4 = vunpack.c.l.b16 %v371_v61 }
  0xb4   :  { %v214_v6 = vadd.f32 %v206_v62, %v1957_v44  ;;  %v1975_v7 = vadd.f32 %v1891_v43, %v171_v63 }
  0xb5   :  { %v410_v8 = vpack.c.b16 %v403_v2, %v402_v0  ;;  %v644_v9 = vpack.c.b16 %v637_v4, %v636_v3  ;;  %v266_v13 = vmul.f32 %v1927_v18, %v1971_v1  ;;  %v344_v14 = vmul.f32 %v1936_v21, %v1971_v1 }
  0xb6   :  { %v1614_v10 = vpop.eup %1613  ;;  %v222_v11 = vmul.f32 0.7978846, %v214_v6  ;;  %v191_v12 = vmul.f32 %v1975_v7, %v1975_v7  ;;  %v279_v36 = vmul.f32 %v1929_v19, %v1971_v1  ;;  %v357_v37 = vmul.f32 %v1938_v22, %v1971_v1 }
  0xb7   :  { %v237_v5 = vadd.f32 1.0, %v1614_v10  ;;  %474 = vmatmul.bf16.vlgmr.msra.gmra.mxu2 %v410_v8  ;;  %708 = vmatmul.bf16.vlgmr.msrb.gmra.mxu1 %v644_v9  ;;  %v286_v29 = vadd.f32 %v278_v17, %v266_v13  ;;  %v364_v31 = vadd.f32 %v356_v26, %v344_v14  ;;  %v1563_v14 = vld [vmem:[%s2650_s9 + $0x10] sm:$0xff] }
  0xb8   :  { %1615 = vtanh.f32 %v222_v11  ;;  %v199_v16 = vmul.f32 %v191_v12, %v1975_v7  ;;  %v1564_v11 = vld [vmem:[%s2650_s9 + $0x18] sm:$0xff] }
  0xb9   :  { %v245_v23 = vmul.f32 0.5, %v237_v5  ;;  %v135_v25 = vpop.f32.mrf.mxu0  ;;  %v294_v46 = vpack.c.bf16 %v286_v29, %v286_v29  ;;  %v372_v50 = vpack.c.bf16 %v364_v31, %v364_v31  ;;  %587 = vmatpush.bf16.msrb.mxu3 %v1564_v11 }
  0xba   :  { %v207_v27 = vmul.f32 0.044715, %v199_v16  ;;  %v172_v28 = vadd.f32 %v1880_v40, %v135_v25 }
  0xbb   :  { %v1993_v30 = vmul.f32 %v245_v23, %v1941_v24  ;;  %v404_v59 = vunpack.c.l.b16 %v294_v46  ;;  %v638_v62 = vunpack.c.l.b16 %v372_v50 }
  0xbc   :  { %v215_v33 = vadd.f32 %v207_v27, %v1975_v7  ;;  %v2000_v34 = vadd.f32 %v1891_v43, %v172_v28 }
  0xbd   :  { %v267_v35 = vmul.f32 %v1927_v18, %v1993_v30  ;;  %v345_v24 = vmul.f32 %v1936_v21, %v1993_v30  ;;  %v280_v12 = vmul.f32 %v1929_v19, %v1993_v30  ;;  %v358_v5 = vmul.f32 %v1938_v22, %v1993_v30  ;;  %588 = vmatpush.bf16.msrb.mxu3 %v1563_v14 }
  0xbe   :  { %v1616_v41 = vpop.eup %1615  ;;  %v223_v42 = vmul.f32 0.7978846, %v215_v33  ;;  %v192_v45 = vmul.f32 %v2000_v34, %v2000_v34 }
  0xbf   :  { %v238_v47 = vadd.f32 1.0, %v1616_v41  ;;  %v287_v48 = vadd.f32 %v279_v36, %v267_v35  ;;  %v365_v49 = vadd.f32 %v357_v37, %v345_v24 }
  0xc0   :  { %1617 = vtanh.f32 %v223_v42  ;;  %v200_v51 = vmul.f32 %v192_v45, %v2000_v34  ;;  %v1561_v45 = vld [vmem:[%s2650_s9] sm:$0xff] }
  0xc1   :  { %v246_v52 = vmul.f32 0.5, %v238_v47  ;;  %v137_v53 = vpop.f32.mrf.mxu0  ;;  %v295_v54 = vpack.c.bf16 %v287_v48, %v287_v48  ;;  %v373_v55 = vpack.c.bf16 %v365_v49, %v365_v49 }
  0xc2   :  { %v208_v57 = vmul.f32 0.044715, %v200_v51  ;;  %v173_v58 = vadd.f32 %v1880_v40, %v137_v53 }
  0xc3   :  { %v2021_v60 = vmul.f32 %v246_v52, %v1957_v44  ;;  %v405_v61 = vunpack.c.l.b16 %v295_v54  ;;  %v639_v63 = vunpack.c.l.b16 %v373_v55 }
  0xc4   :  { %v216_v0 = vadd.f32 %v208_v57, %v2000_v34  ;;  %v185_v2 = vadd.f32 %v1891_v43, %v173_v58 }
  0xc5   :  { %v411_v3 = vpack.c.b16 %v405_v61, %v404_v59  ;;  %v645_v4 = vpack.c.b16 %v639_v63, %v638_v62  ;;  %v268_v40 = vmul.f32 %v1927_v18, %v2021_v60  ;;  %v346_v44 = vmul.f32 %v1936_v21, %v2021_v60  ;;  %v259_v63 = vld [vmem:[%s2652_s6] sm:$0x1] }
  0xc6   :  { %v1618_v6 = vpop.eup %1617  ;;  %v224_v8 = vmul.f32 0.7978846, %v216_v0  ;;  %v193_v9 = vmul.f32 %v185_v2, %v185_v2  ;;  %v281_v27 = vmul.f32 %v1929_v19, %v2021_v60  ;;  %v359_v29 = vmul.f32 %v1938_v22, %v2021_v60 }
  0xc7   :  { %v239_v10 = vadd.f32 1.0, %v1618_v6  ;;  %479 = vmatmul.bf16.gmra.mxu2 %v411_v3  ;;  %713 = vmatmul.bf16.gmra.mxu1 %v645_v4  ;;  %v288_v16 = vadd.f32 %v280_v12, %v268_v40  ;;  %v366_v23 = vadd.f32 %v358_v5, %v346_v44 }
  0xc8   :  { %1619 = vtanh.f32 %v224_v8  ;;  %v201_v43 = vmul.f32 %v193_v9, %v185_v2 }
  0xc9   :  { %v247_v13 = vmul.f32 0.5, %v239_v10  ;;  %v296_v33 = vpack.c.bf16 %v288_v16, %v288_v16  ;;  %v374_v37 = vpack.c.bf16 %v366_v23, %v366_v23 }
  0xca   :  { %v209_v15 = vmul.f32 0.044715, %v201_v43 }
  0xcb   :  { %v2040_v17 = vmul.f32 %v247_v13, %v1975_v7  ;;  %v1562_v7 = vld [vmem:[%s2650_s9 + $0x8] sm:$0xff]  ;;  %v406_v46 = vunpack.c.l.b16 %v296_v33  ;;  %v640_v49 = vunpack.c.l.b16 %v374_v37 }
  0xcc   :  { %v217_v25 = vadd.f32 %v209_v15, %v185_v2  ;;  %589 = vmatpush.bf16.msrb.mxu3 %v1562_v7 }
  0xcd   :  { %v269_v26 = vmul.f32 %v1927_v18, %v2040_v17  ;;  %v347_v28 = vmul.f32 %v1936_v21, %v2040_v17  ;;  %v360_v58 = vmul.f32 %v1938_v22, %v2040_v17 }
  0xce   :  { %v1620_v31 = vpop.eup %1619  ;;  %v225_v32 = vmul.f32 0.7978846, %v217_v25 }
  0xcf   :  { %v240_v35 = vadd.f32 1.0, %v1620_v31  ;;  %v289_v36 = vadd.f32 %v281_v27, %v269_v26  ;;  %v367_v24 = vadd.f32 %v359_v29, %v347_v28 }
  0xd0   :  { %1621 = vtanh.f32 %v225_v32  ;;  %590 = vmatpush.bf16.msrb.mxu3 %v1561_v45 }
  0xd1   :  { %v248_v38 = vmul.f32 0.5, %v240_v35  ;;  %v297_v41 = vpack.c.bf16 %v289_v36, %v289_v36  ;;  %v375_v42 = vpack.c.bf16 %v367_v24, %v367_v24 }
  0xd3   :  { %v2057_v47 = vmul.f32 %v248_v38, %v2000_v34  ;;  %v407_v48 = vunpack.c.l.b16 %v297_v41  ;;  %v641_v50 = vunpack.c.l.b16 %v375_v42  ;;  %v282_v34 = vmul.f32 %v1929_v19, %v2040_v17 }
  0xd5   :  { %v412_v51 = vpack.c.b16 %v407_v48, %v406_v46  ;;  %v646_v52 = vpack.c.b16 %v641_v50, %v640_v49  ;;  %v270_v55 = vmul.f32 %v1927_v18, %v2057_v47  ;;  %v348_v56 = vmul.f32 %v1936_v21, %v2057_v47 }
  0xd6   :  { %v1622_v53 = vpop.eup %1621  ;;  %v283_v3 = vmul.f32 %v1929_v19, %v2057_v47  ;;  %v361_v6 = vmul.f32 %v1938_v22, %v2057_v47  ;;  %v1604_v19 = vld [vmem:[%s2652_s6] ss:$0 sm:$0xff] }
  0xd7   :  { %v241_v54 = vadd.f32 1.0, %v1622_v53  ;;  %484 = vmatmul.bf16.vlgmr.msra.gmra.mxu3 %v412_v51  ;;  %718 = vmatmul.bf16.gmra.mxu1 %v646_v52  ;;  %v290_v61 = vadd.f32 %v282_v34, %v270_v55  ;;  %v368_v62 = vadd.f32 %v360_v58, %v348_v56  ;;  %v304_v22 = vmul.f32 %v1604_v19, %v1953_v39 }
  0xd8   :  { %v303_v15 = vmul.f32 %v1604_v19, %v1931_v20  ;;  %v306_v32 = vmul.f32 %v1604_v19, %v1993_v30  ;;  %v305_v33 = vmul.f32 %v1604_v19, %v1971_v1  ;;  %v308_v48 = vmul.f32 %v1604_v19, %v2040_v17 }
  0xd9   :  { %v249_v57 = vmul.f32 0.5, %v241_v54  ;;  %v298_v9 = vpack.c.bf16 %v290_v61, %v290_v61  ;;  %v376_v10 = vpack.c.bf16 %v368_v62, %v368_v62  ;;  %v307_v49 = vmul.f32 %v1604_v19, %v2021_v60 }
  0xda   :  { %v309_v61 = vmul.f32 %v1604_v19, %v2057_v47 }
  0xdb   :  { %v2067_v59 = vmul.f32 %v249_v57, %v185_v2  ;;  %v311_v2 = vsub.f32 1.0, %v259_v63  ;;  %v408_v12 = vunpack.c.l.b16 %v298_v9 }
  0xdd   :  { %v271_v0 = vmul.f32 %v1927_v18, %v2067_v59  ;;  %v349_v4 = vmul.f32 %v1936_v21, %v2067_v59  ;;  %v313_v43 = vperm.slane %v311_v2, 0  ;;  %v642_v18 = vunpack.c.l.b16 %v376_v10 }
  0xde   :  { %v310_v58 = vmul.f32 %v1604_v19, %v2067_v59 }
  0xdf   :  { %v291_v8 = vadd.f32 %v283_v3, %v271_v0  ;;  %v369_v40 = vadd.f32 %v361_v6, %v349_v4  ;;  %v315_v16 = vmul.f32 0.0, %v313_v43  ;;  %v316_v23 = vmul.f32 %v313_v43, %v1931_v20 }
  0xe0   :  { %v318_v35 = vmul.f32 %v313_v43, %v1971_v1  ;;  %v317_v36 = vmul.f32 %v313_v43, %v1953_v39  ;;  %v320_v50 = vmul.f32 %v313_v43, %v2021_v60  ;;  %v319_v51 = vmul.f32 %v313_v43, %v1993_v30 }
  0xe1   :  { %v299_v44 = vpack.c.bf16 %v291_v8, %v291_v8  ;;  %v377_v11 = vpack.c.bf16 %v369_v40, %v369_v40  ;;  %v324_v25 = vadd.f32 %v316_v23, %v304_v22  ;;  %v323_v26 = vadd.f32 %v315_v16, %v303_v15  ;;  %v881_v40 = vld [vmem:[%s2653_s12] sm:$0x1] }
  0xe2   :  { %v326_v24 = vadd.f32 %v318_v35, %v306_v32  ;;  %v325_v37 = vadd.f32 %v317_v36, %v305_v33  ;;  %v328_v52 = vadd.f32 %v320_v50, %v308_v48  ;;  %v327_v53 = vadd.f32 %v319_v51, %v307_v49  ;;  %v2113_v15 = vld [vmem:[%s2651_s13] ss:$0 sm:$0xff] }
  0xe3   :  { %v409_v13 = vunpack.c.l.b16 %v299_v44  ;;  %v643_v5 = vunpack.c.l.b16 %v377_v11  ;;  %v332_v27 = vpack.c.bf16 %v324_v25, %v324_v25  ;;  %v331_v28 = vpack.c.bf16 %v323_v26, %v323_v26  ;;  %v1584_v11 = vld [vmem:[%s2654_s11 + $0x38] sm:$0xff] }
  0xe4   :  { %v334_v38 = vpack.c.bf16 %v326_v24, %v326_v24  ;;  %v333_v41 = vpack.c.bf16 %v325_v37, %v325_v37  ;;  %v336_v54 = vpack.c.bf16 %v328_v52, %v328_v52  ;;  %v335_v55 = vpack.c.bf16 %v327_v53, %v327_v53  ;;  %1228 = vmatpush.bf16.msrb.mxu0 %v1584_v11 }
  0xe5   :  { %v413_v21 = vpack.c.b16 %v409_v13, %v408_v12  ;;  %v647_v14 = vpack.c.b16 %v643_v5, %v642_v18  ;;  %v520_v29 = vunpack.c.l.b16 %v332_v27  ;;  %v519_v7 = vunpack.c.l.b16 %v331_v28  ;;  %v1582_v27 = vld [vmem:[%s2654_s11 + $0x28] sm:$0xff] }
  0xe6   :  { %v522_v42 = vunpack.c.l.b16 %v334_v38  ;;  %v521_v45 = vunpack.c.l.b16 %v333_v41  ;;  %v524_v56 = vunpack.c.l.b16 %v336_v54  ;;  %v523_v57 = vunpack.c.l.b16 %v335_v55 }
  0xe7   :  { %489 = vmatmul.bf16.gmra.mxu3 %v413_v21  ;;  %723 = vmatmul.bf16.gmra.mxu1 %v647_v14  ;;  %v527_v31 = vpack.c.b16 %v520_v29, %v519_v7  ;;  %v322_v62 = vmul.f32 %v313_v43, %v2057_v47  ;;  %v321_v63 = vmul.f32 %v313_v43, %v2040_v17  ;;  %v882_v10 = vmul.f32 1.442695, %v881_v40  ;;  %v1583_v21 = vld [vmem:[%s2654_s11 + $0x30] sm:$0xff]  ;;  %v1580_v40 = vld [vmem:[%s2654_s11 + $0x18] sm:$0xff] }
  0xe8   :  { %v528_v46 = vpack.c.b16 %v522_v42, %v521_v45  ;;  %v529_v34 = vpack.c.b16 %v524_v56, %v523_v57  ;;  %1229 = vmatpush.bf16.msrb.mxu0 %v1583_v21  ;;  %v1581_v42 = vld [vmem:[%s2654_s11 + $0x20] sm:$0xff] }
  0xe9   :  { %v330_v0 = vadd.f32 %v322_v62, %v310_v58  ;;  %v329_v3 = vadd.f32 %v321_v63, %v309_v61  ;;  %1623 = vpow2.f32 %v882_v10 }
  0xeb   :  { %v338_v4 = vpack.c.bf16 %v330_v0, %v330_v0  ;;  %v337_v6 = vpack.c.bf16 %v329_v3, %v329_v3 }
  0xec   :  { %1230 = vmatpush.bf16.msrb.mxu0 %v1582_v27 }
  0xed   :  { %v526_v2 = vunpack.c.l.b16 %v338_v4  ;;  %v525_v8 = vunpack.c.l.b16 %v337_v6 }
  0xef   :  { %v530_v9 = vpack.c.b16 %v526_v2, %v525_v8  ;;  %v1624_v43 = vpop.eup %1623 }
  0xf0   :  { %v884_v18 = vsub.f32 0.0, %v1624_v43  ;;  %1231 = vmatpush.bf16.msrb.mxu0 %v1581_v42 }
  0xf2   :  { %v2104_v19 = vperm.slane %v884_v18, 0 }
  0xf4   :  { %v908_v14 = vadd.f32 -1e+30, %v2104_v19  ;;  %1232 = vmatpush.bf16.msrb.mxu0 %v1580_v40 }
  0xf7   :  { %591 = vmatmul.bf16.vlgmr.msrb.gmra.mxu3 %v527_v31 }
 0x107   :  { %596 = vmatmul.bf16.gmra.mxu3 %v528_v46 }
 0x117   :  { %601 = vmatmul.bf16.gmra.mxu3 %v529_v34 }
 0x127   :  { %606 = vmatmul.bf16.gmra.mxu3 %v530_v9 }
 0x134   :  { %v709_v44 = vpop.f32.mrf.mxu1 }
 0x135   :  { %v1479_v13 = vmul.f32 -1.442695, %v709_v44 }
 0x137   :  { %1625 = vpow2.f32 %v1479_v13  ;;  %v1579_v13 = vld [vmem:[%s2654_s11 + $0x10] sm:$0xff] }
 0x138   :  { %1233 = vmatpush.bf16.msrb.mxu0 %v1579_v13 }
 0x13a   :  { %v475_v12 = vpop.f32.mrf.mxu2 }
 0x13b   :  { %v909_v26 = vmax.f32 %v908_v14, %v475_v12  ;;  %v889_v29 = vadd.f32 %v2113_v15, %v475_v12 }
 0x13c   :  { %v711_v5 = vpop.f32.mrf.mxu1 }
 0x13d   :  { %v1480_v16 = vmul.f32 -1.442695, %v711_v5  ;;  %v1626_v23 = vpop.eup %1625  ;;  %v910_v7 = vsub.f32 %v908_v14, %v909_v26  ;;  %v938_v31 = vadd.f32 %v909_v26, %v2104_v19  ;;  %v890_v32 = vmax.f32 %v889_v29, -1e+30 }
 0x13e   :  { %v2118_v28 = vadd.f32 1.0, %v1626_v23  ;;  %v913_v37 = vsub.f32 %v475_v12, %v909_v26 }
 0x13f   :  { %1627 = vpow2.f32 %v1480_v16  ;;  %v911_v45 = vmul.f32 1.442695, %v910_v7  ;;  %v891_v46 = vsub.f32 -1e+30, %v890_v32  ;;  %v894_v55 = vsub.f32 %v889_v29, %v890_v32 }
 0x140   :  { %1629 = vrcp.f32 %v2118_v28  ;;  %v914_v53 = vmul.f32 1.442695, %v913_v37  ;;  %v772_v3 = vand.u32 2147483648, %v2118_v28  ;;  %v770_v21 = vand.u32 2147483647, %v2118_v28  ;;  %v1578_v37 = vld [vmem:[%s2654_s11 + $0x8] sm:$0xff] }
 0x141   :  { %v892_v58 = vmul.f32 1.442695, %v891_v46  ;;  %v895_v4 = vmul.f32 1.442695, %v894_v55  ;;  %vm766_vm1 = vweird.f32 %v2118_v28  ;;  %1234 = vmatpush.bf16.msrb.mxu0 %v1578_v37 }
 0x142   :  { %v477_v22 = vpop.f32.mrf.mxu2  ;;  %v2170_v14 = vor.u32 1.1754944e-38, %v772_v3  ;;  %vm2208_vm3 = vcmp.eq.f32.partialorder %v770_v21, 8.507059e+37 }
 0x143   :  { %v2123_v35 = vmax.f32 %v938_v31, %v477_v22  ;;  %v920_v38 = vadd.f32 %v2113_v15, %v477_v22 }
 0x144   :  { %v714_v25 = vpop.f32.mrf.mxu1 }
 0x145   :  { %v1481_v33 = vmul.f32 -1.442695, %v714_v25  ;;  %v1628_v24 = vpop.eup %1627  ;;  %v940_v50 = vsub.f32 %v938_v31, %v2123_v35  ;;  %v969_v51 = vadd.f32 %v2123_v35, %v2104_v19  ;;  %v921_v54 = vmax.f32 %v909_v26, %v920_v38 }
 0x146   :  { %v2133_v49 = vadd.f32 1.0, %v1628_v24  ;;  %v2138_v52 = vpop.eup %1629  ;;  %v943_v34 = vsub.f32 %v477_v22, %v2123_v35 }
 0x147   :  { %1631 = vpow2.f32 %v1481_v33  ;;  %v762_v61 = vmul.f32 %v2138_v52, %v2118_v28  ;;  %v941_v62 = vmul.f32 1.442695, %v940_v50  ;;  %v922_v0 = vsub.f32 %v909_v26, %v921_v54 }
 0x148   :  { %1633 = vpow2.f32 %v911_v45  ;;  %v925_v10 = vsub.f32 %v920_v38, %v921_v54  ;;  %v944_v44 = vmul.f32 1.442695, %v943_v34  ;;  %vm767_vm2 = vweird.f32 %v2138_v52 }
 0x149   :  { %1635 = vrcp.f32 %v2133_v49  ;;  %v763_v43 = vsub.f32 1.0, %v762_v61  ;;  %v923_v18 = vmul.f32 1.442695, %v922_v0  ;;  %v1577_v0 = vld [vmem:[%s2654_s11] sm:$0xff]  ;;  %vm2245_vm4 = vmor %vm766_vm1, %vm767_vm2  ;;  %vm781_vm5 = vweird.f32 %v2133_v49 }
 0x14a   :  { %v2125_v36 = vpop.f32.mrf.mxu2  ;;  %1637 = vpow2.f32 %v914_v53  ;;  %v926_v29 = vmul.f32 1.442695, %v925_v10  ;;  %v787_v53 = vand.u32 2147483648, %v2133_v49  ;;  %1235 = vmatpush.bf16.msrb.mxu0 %v1577_v0 }
 0x14b   :  { %v2141_v56 = vmax.f32 %v969_v51, %v2125_v36  ;;  %v2150_v6 = vadd.f32 %v2113_v15, %v2125_v36  ;;  %v764_v24 = vmul.f32 %v2138_v52, %v763_v43 }
 0x14c   :  { %v716_v48 = vpop.f32.mrf.mxu1  ;;  %v2250_v21 = vor.u32 1.1754944e-38, %v787_v53 }
 0x14d   :  { %v1482_v57 = vmul.f32 -1.442695, %v716_v48  ;;  %v1632_v63 = vpop.eup %1631  ;;  %v971_v2 = vsub.f32 %v969_v51, %v2141_v56  ;;  %v952_v16 = vmax.f32 %v2123_v35, %v2150_v6  ;;  %v1000_v25 = vadd.f32 %v2141_v56, %v2104_v19 }
 0x14e   :  { %v1634_v11 = vpop.eup %1633  ;;  %v2160_v12 = vadd.f32 1.0, %v1632_v63  ;;  %v974_v32 = vsub.f32 %v2125_v36, %v2141_v56  ;;  %v785_v51 = vand.u32 2147483647, %v2133_v49 }
 0x14f   :  { %1639 = vpow2.f32 %v1482_v57  ;;  %v2172_v22 = vpop.eup %1635  ;;  %v972_v23 = vmul.f32 1.442695, %v971_v2  ;;  %v2182_v7 = vmul.f32 0.0, %v1634_v11  ;;  %v953_v48 = vsub.f32 %v2123_v35, %v952_v16 }
 0x150   :  { %1641 = vpow2.f32 %v892_v58  ;;  %v2179_v27 = vpop.eup %1637  ;;  %v777_v42 = vmul.f32 %v2172_v22, %v2133_v49  ;;  %v956_v54 = vsub.f32 %v2150_v6, %v952_v16  ;;  %v975_v58 = vmul.f32 1.442695, %v974_v32 }
 0x151   :  { %1643 = vpow2.f32 %v941_v62  ;;  %v919_v34 = vadd.f32 %v2179_v27, %v2182_v7  ;;  %v765_v62 = vadd.f32 %v2138_v52, %v764_v24  ;;  %v954_v10 = vmul.f32 1.442695, %v953_v48 }
 0x152   :  { %v2153_v8 = vpop.f32.mrf.mxu2  ;;  %1645 = vpow2.f32 %v895_v4  ;;  %v778_v4 = vsub.f32 1.0, %v777_v42  ;;  %vm782_vm6 = vweird.f32 %v2172_v22  ;;  %vm2287_vm7 = vcmp.eq.f32.partialorder %v785_v51, 8.507059e+37 }
 0x153   :  { %v2167_v5 = vadd.f32 %v2113_v15, %v2153_v8  ;;  %1647 = vpow2.f32 %v944_v44  ;;  %v2188_v33 = vmax.f32 %v1000_v25, %v2153_v8  ;;  %vm796_vm8 = vweird.f32 %v2160_v12  ;;  %vm2314_vm9 = vmor %vm781_vm5, %vm782_vm6 }
 0x154   :  { %v719_v26 = vpop.f32.mrf.mxu1  ;;  %1649 = vrcp.f32 %v2160_v12  ;;  %v779_v24 = vmul.f32 %v2172_v22, %v778_v4 }
 0x155   :  { %v1640_v31 = vpop.eup %1639  ;;  %1651 = vpow2.f32 %v923_v18  ;;  %v983_v45 = vmax.f32 %v2141_v56, %v2167_v5  ;;  %v1483_v46 = vmul.f32 -1.442695, %v719_v26  ;;  %v1002_v61 = vsub.f32 %v1000_v25, %v2188_v33 }
 0x156   :  { %v1642_v38 = vpop.eup %1641  ;;  %1653 = vpow2.f32 %v972_v23  ;;  %v2206_v55 = vadd.f32 1.0, %v1640_v31  ;;  %v1031_v43 = vadd.f32 %v2188_v33, %v2104_v19  ;;  %v957_v18 = vmul.f32 1.442695, %v956_v54 }
 0x157   :  { %v2198_v36 = vpop.eup %1643  ;;  %1655 = vpow2.f32 %v926_v29  ;;  %v2218_v63 = vmul.f32 0.0, %v1642_v38  ;;  %v984_v6 = vsub.f32 %v2141_v56, %v983_v45  ;;  %v987_v44 = vsub.f32 %v2167_v5, %v983_v45 }
 0x158   :  { %v2214_v35 = vpop.eup %1645  ;;  %1657 = vpow2.f32 %v1483_v46  ;;  %v949_v2 = vmul.f32 %v2198_v36, %v919_v34  ;;  %v1005_v56 = vsub.f32 %v2153_v8, %v2188_v33  ;;  %v1003_v23 = vmul.f32 1.442695, %v1002_v61 }
 0x159   :  { %v2223_v3 = vpop.eup %1647  ;;  %1659 = vrcp.f32 %v2206_v55  ;;  %v769_v8 = vsel %vm2245_vm4, %v2138_v52, %v765_v62  ;;  %v985_v29 = vmul.f32 1.442695, %v984_v6  ;;  %v988_v37 = vmul.f32 1.442695, %v987_v44 }
 0x15a   :  { %v2128_v41 = vpop.f32.mrf.mxu3  ;;  %v2227_v40 = vpop.eup %1649  ;;  %1661 = vpow2.f32 %v975_v58  ;;  %v2265_v32 = vadd.f32 %v2223_v3, %v949_v2  ;;  %v1006_v46 = vmul.f32 1.442695, %v1005_v56  ;;  %v900_v48 = vadd.f32 %v2214_v35, %v2218_v63 }
 0x15b   :  { %v2232_v11 = vadd.f32 %v2113_v15, %v2128_v41  ;;  %v2236_v13 = vpop.eup %1651  ;;  %v2255_v25 = vmax.f32 %v1031_v43, %v2128_v41  ;;  %v792_v26 = vmul.f32 %v2227_v40, %v2160_v12  ;;  %1663 = vpow2.f32 %v954_v10 }
 0x15c   :  { %v2252_v16 = vpop.eup %1653  ;;  %v721_v31 = vpop.f32.mrf.mxu1  ;;  %v931_v52 = vmul.f32 %v2236_v13, %v919_v34  ;;  %1665 = vpow2.f32 %v957_v18  ;;  %v2281_v58 = vsel %vm2208_vm3, %v2170_v14, %v769_v8  ;;  %v780_v0 = vadd.f32 %v2172_v22, %v779_v24 }
 0x15d   :  { %v2260_v28 = vpop.eup %1655  ;;  %v1014_v38 = vmax.f32 %v2188_v33, %v2232_v11  ;;  %v980_v53 = vmul.f32 %v2252_v16, %v2265_v32  ;;  %1667 = vpow2.f32 %v1003_v23  ;;  %v1033_v54 = vsub.f32 %v1031_v43, %v2255_v25 }
 0x15e   :  { %v1658_v45 = vpop.eup %1657  ;;  %v793_v61 = vsub.f32 1.0, %v792_v26  ;;  %1669 = vpow2.f32 %v985_v29  ;;  %v1484_v62 = vmul.f32 -1.442695, %v721_v31  ;;  %v932_v57 = vadd.f32 %v2260_v28, %v931_v52 }
 0x15f   :  { %v2284_v34 = vpop.eup %1659  ;;  %1671 = vpow2.f32 %v988_v37  ;;  %v2293_v2 = vadd.f32 1.0, %v1658_v45  ;;  %v1015_v14 = vsub.f32 %v2188_v33, %v1014_v38  ;;  %v1018_v10 = vsub.f32 %v2232_v11, %v1014_v38 }
 0x160   :  { %v2291_v6 = vpop.eup %1661  ;;  %1673 = vpow2.f32 %v1006_v46  ;;  %v807_v43 = vmul.f32 %v2284_v34, %v2206_v55  ;;  %v1034_v18 = vmul.f32 1.442695, %v1033_v54  ;;  %v1036_v56 = vsub.f32 %v2128_v41, %v2255_v25 }
 0x161   :  { %v2299_v44 = vadd.f32 %v2291_v6, %v980_v53  ;;  %v2302_v51 = vpop.eup %1663  ;;  %v1062_v33 = vadd.f32 %v2255_v25, %v2104_v19  ;;  %1675 = vpow2.f32 %v1484_v62  ;;  %v784_v41 = vsel %vm2314_vm9, %v2172_v22, %v780_v0 }
 0x162   :  { %v2155_v9 = vpop.f32.mrf.mxu3  ;;  %v2318_v5 = vpop.eup %1665  ;;  %v794_v8 = vmul.f32 %v2227_v40, %v793_v61  ;;  %1677 = vrcp.f32 %v2293_v2  ;;  %v1016_v49 = vmul.f32 1.442695, %v1015_v14  ;;  %v800_v24 = vand.u32 2147483647, %v2160_v12 }
 0x163   :  { %v2322_v23 = vadd.f32 %v2113_v15, %v2155_v9  ;;  %v2328_v26 = vpop.eup %1667  ;;  %v2332_v29 = vmax.f32 %v1062_v33, %v2155_v9  ;;  %v1019_v38 = vmul.f32 1.442695, %v1018_v10  ;;  %1679 = vrcp.f32 %v900_v48 }
 0x164   :  { %v2335_v37 = vpop.eup %1669  ;;  %v724_v52 = vpop.f32.mrf.mxu1  ;;  %v808_v53 = vsub.f32 1.0, %v807_v43  ;;  %1681 = vpow2.f32 %v1034_v18  ;;  %v1037_v54 = vmul.f32 1.442695, %v1036_v56  ;;  %v802_v61 = vand.u32 2147483648, %v2160_v12 }
 0x165   :  { %v2339_v46 = vpop.eup %1671  ;;  %v1045_v0 = vmax.f32 %v2255_v25, %v2322_v23  ;;  %v795_v10 = vadd.f32 %v2227_v40, %v794_v8  ;;  %vm797_vm10 = vweird.f32 %v2227_v40  ;;  %1683 = vpow2.f32 %v1016_v49 }
 0x166   :  { %v2342_v62 = vpop.eup %1673  ;;  %v789_v48 = vsel %vm2287_vm7, %v2250_v21, %v784_v41  ;;  %1685 = vpow2.f32 %v1019_v38  ;;  %vm2362_vm11 = vcmp.eq.f32.partialorder %v800_v24, 8.507059e+37  ;;  %v1485_v11 = vmul.f32 -1.442695, %v724_v52  ;;  %vm2372_vm12 = vmor %vm796_vm8, %vm797_vm10 }
 0x167   :  { %v1676_v43 = vpop.eup %1675  ;;  %v809_v4 = vmul.f32 %v2284_v34, %v808_v53  ;;  %vm811_vm13 = vweird.f32 %v2206_v55  ;;  %1687 = vpow2.f32 %v1037_v54  ;;  %v1046_v8 = vsub.f32 %v2255_v25, %v1045_v0 }
 0x168   :  { %v1049_v24 = vsub.f32 %v2322_v23, %v1045_v0  ;;  %1689 = vrcp.f32 %v932_v57  ;;  %v1093_v54 = vadd.f32 %v2332_v29, %v2104_v19  ;;  %vm812_vm14 = vweird.f32 %v2284_v34 }
 0x169   :  { %1691 = vpow2.f32 %v1485_v11  ;;  %v815_v21 = vand.u32 2147483647, %v2206_v55  ;;  %vm2419_vm15 = vmor %vm811_vm13, %vm812_vm14  ;;  %vm826_vm1 = vweird.f32 %v2293_v2 }
 0x16a   :  { %v2201_v50 = vpop.f32.mrf.mxu3 }
 0x16b   :  { %v2411_v11 = vadd.f32 %v2113_v15, %v2201_v50  ;;  %vm2446_vm0 = vcmp.eq.f32.partialorder %v815_v21, 8.507059e+37 }
 0x16c   :  { %v726_v0 = vpop.f32.mrf.mxu1 }
 0x172   :  { %v2270_v42 = vpop.f32.mrf.mxu3 }
 0x17a   :  { %v592_v31 = vpop.f32.mrf.mxu3 }
 0x17b   :  { %v898_v45 = vmul.f32 %v2214_v35, %v592_v31  ;;  %v917_v22 = vmul.f32 %v2179_v27, %v592_v31  ;;  %v1064_v27 = vsub.f32 %v1062_v33, %v2332_v29  ;;  %v2352_v35 = vmul.f32 %v2302_v51, %v2265_v32  ;;  %v2366_v33 = vpop.eup %1677 }
 0x17c   :  { %v1067_v32 = vsub.f32 %v2155_v9, %v2332_v29  ;;  %v1680_v41 = vpop.eup %1679  ;;  %v799_v9 = vsel %vm2372_vm12, %v2227_v40, %v795_v10  ;;  %v2385_v31 = vadd.f32 1.0, %v1676_v43  ;;  %v2404_v10 = vadd.f32 %v2284_v34, %v809_v4 }
 0x17d   :  { %v899_v14 = vadd.f32 %v898_v45, %v2218_v63  ;;  %v918_v18 = vadd.f32 %v917_v22, %v2182_v7  ;;  %v2360_v63 = vmul.f32 %v2328_v26, %v2299_v44  ;;  %v803_v7 = vor.u32 1.1754944e-38, %v802_v61  ;;  %v2383_v12 = vpop.eup %1681 }
 0x17e   :  { %v1065_v38 = vmul.f32 1.442695, %v1064_v27  ;;  %v822_v45 = vmul.f32 %v2366_v33, %v2293_v2  ;;  %v2393_v53 = vpop.eup %1683  ;;  %v1068_v40 = vmul.f32 1.442695, %v1067_v32  ;;  %v1047_v61 = vmul.f32 1.442695, %v1046_v8 }
 0x17f   :  { %v901_v49 = vmul.f32 %v899_v14, %v2281_v58  ;;  %v928_v25 = vmul.f32 %v2236_v13, %v918_v18  ;;  %v804_v57 = vsel %vm2362_vm11, %v803_v7, %v799_v9  ;;  %v2399_v23 = vpop.eup %1685  ;;  %v946_v13 = vmul.f32 %v2198_v36, %v918_v18 }
 0x180   :  { %1693 = vrcp.f32 %v2385_v31  ;;  %v2407_v19 = vpop.eup %1687  ;;  %v823_v27 = vsub.f32 1.0, %v822_v45  ;;  %v2414_v36 = vmax.f32 %v1093_v54, %v2201_v50  ;;  %v1486_v18 = vmul.f32 -1.442695, %v726_v0 }
 0x181   :  { %1695 = vpow2.f32 %v1065_v38  ;;  %v1690_v32 = vpop.eup %1689  ;;  %v814_v9 = vsel %vm2419_vm15, %v2284_v34, %v2404_v10  ;;  %v993_v38 = vmul.f32 %v2335_v37, %v2299_v44  ;;  %vm827_vm2 = vweird.f32 %v2366_v33 }
 0x182   :  { %v594_v52 = vpop.f32.mrf.mxu3  ;;  %1697 = vpow2.f32 %v1047_v61  ;;  %v1692_v8 = vpop.eup %1691  ;;  %v1095_v34 = vsub.f32 %v1093_v54, %v2414_v36  ;;  %vm2498_vm3 = vmor %vm826_vm1, %vm827_vm2  ;;  %vm841_vm6 = vweird.f32 %v2385_v31 }
 0x183   :  { %v929_v58 = vmul.f32 %v2260_v28, %v594_v52  ;;  %v947_v22 = vmul.f32 %v2223_v3, %v594_v52  ;;  %v903_v28 = vmul.f32 %v1680_v41, %v901_v49  ;;  %v1050_v3 = vmul.f32 1.442695, %v1049_v24 }
 0x184   :  { %v963_v24 = vadd.f32 %v2318_v5, %v2352_v35  ;;  %v824_v35 = vmul.f32 %v2366_v33, %v823_v27  ;;  %v994_v54 = vadd.f32 %v2339_v46, %v993_v38 }
 0x185   :  { %v930_v14 = vadd.f32 %v929_v58, %v928_v25  ;;  %v948_v56 = vadd.f32 %v947_v22, %v946_v13  ;;  %v1132_v4 = vpack.c.bf16 %v903_v28, %v903_v28  ;;  %1699 = vpow2.f32 %v1050_v3 }
 0x186   :  { %v2435_v58 = vpop.eup %1693  ;;  %v1076_v22 = vmax.f32 %v2332_v29, %v2411_v11  ;;  %1701 = vpow2.f32 %v1486_v18  ;;  %v2453_v28 = vadd.f32 1.0, %v1692_v8  ;;  %v1096_v18 = vmul.f32 1.442695, %v1095_v34 }
 0x187   :  { %v933_v43 = vmul.f32 %v930_v14, %v789_v48  ;;  %v817_v48 = vand.u32 2147483648, %v2206_v55  ;;  %v959_v52 = vmul.f32 %v2302_v51, %v948_v56  ;;  %v2441_v61 = vpop.eup %1695  ;;  %v977_v51 = vmul.f32 %v2252_v16, %v948_v56 }
 0x188   :  { %v1164_v0 = vunpack.c.l.b16 %v1132_v4  ;;  %1703 = vrcp.f32 %v963_v24  ;;  %v2451_v13 = vpop.eup %1697  ;;  %v1077_v27 = vsub.f32 %v2332_v29, %v1076_v22  ;;  %v2463_v56 = vadd.f32 %v2366_v33, %v824_v35 }
 0x189   :  { %v935_v7 = vmul.f32 %v1690_v32, %v933_v43  ;;  %1705 = vpow2.f32 %v1068_v40  ;;  %v818_v43 = vor.u32 1.1754944e-38, %v817_v48  ;;  %v1080_v32 = vsub.f32 %v2411_v11, %v1076_v22 }
 0x18a   :  { %v597_v49 = vpop.f32.mrf.mxu3  ;;  %1707 = vrcp.f32 %v994_v54  ;;  %v1078_v48 = vmul.f32 1.442695, %v1077_v27  ;;  %v830_v34 = vand.u32 2147483647, %v2293_v2  ;;  %vm842_vm5 = vweird.f32 %v2435_v58 }
 0x18b   :  { %v960_v45 = vmul.f32 %v2318_v5, %v597_v49  ;;  %v978_v55 = vmul.f32 %v2291_v6, %v597_v49  ;;  %v1133_v25 = vpack.c.bf16 %v935_v7, %v935_v7  ;;  %v1098_v6 = vsub.f32 %v2201_v50, %v2414_v36  ;;  %v2455_v16 = vpop.eup %1699  ;;  %vm2549_vm7 = vmor %vm841_vm6, %vm842_vm5 }
 0x18c   :  { %v2460_v50 = vadd.f32 %v2113_v15, %v2270_v42  ;;  %v1702_v21 = vpop.eup %1701  ;;  %v837_v7 = vmul.f32 %v2435_v58, %v2385_v31  ;;  %v1012_v15 = vadd.f32 %v2342_v62, %v2360_v63  ;;  %1709 = vrcp.f32 %v2453_v28 }
 0x18d   :  { %v961_v44 = vadd.f32 %v960_v45, %v959_v52  ;;  %v1165_v5 = vunpack.c.l.b16 %v1133_v25  ;;  %v979_v3 = vadd.f32 %v978_v55, %v977_v51  ;;  %v2469_v29 = vmul.f32 1.442695, %v1098_v6 }
 0x18e   :  { %v1704_v41 = vpop.eup %1703  ;;  %v2479_v8 = vmax.f32 %v2414_v36, %v2460_v50  ;;  %v1042_v49 = vmul.f32 %v2383_v12, %v1012_v15  ;;  %v2485_v63 = vadd.f32 1.0, %v1702_v21  ;;  %v838_v52 = vsub.f32 1.0, %v837_v7 }
 0x18f   :  { %v1172_v10 = vpack.c.b16 %v1165_v5, %v1164_v0  ;;  %v964_v40 = vmul.f32 %v961_v44, %v804_v57  ;;  %v990_v42 = vmul.f32 %v2335_v37, %v979_v3  ;;  %v2483_v24 = vpop.eup %1705  ;;  %v1008_v37 = vmul.f32 %v2328_v26, %v979_v3 }
 0x190   :  { %v819_v45 = vsel %vm2446_vm0, %v818_v43, %v814_v9  ;;  %v1024_v55 = vmul.f32 %v2393_v53, %v1012_v15  ;;  %1711 = vpow2.f32 %v1096_v18  ;;  %v1708_v35 = vpop.eup %1707  ;;  %v1108_v44 = vsub.f32 %v2414_v36, %v2479_v8 }
 0x191   :  { %1236 = vmatmul.bf16.vlgmr.msrb.gmra.mxu0 %v1172_v10  ;;  %1713 = vpow2.f32 %v1078_v48  ;;  %v832_v9 = vand.u32 2147483648, %v2293_v2  ;;  %v1043_v51 = vadd.f32 %v2407_v19, %v1042_v49  ;;  %v829_v36 = vsel %vm2498_vm3, %v2366_v33, %v2463_v56 }
 0x192   :  { %v599_v4 = vpop.f32.mrf.mxu3  ;;  %v2504_v0 = vpop.eup %1709  ;;  %1715 = vrcp.f32 %v2485_v63  ;;  %v839_v54 = vmul.f32 %v2435_v58, %v838_v52  ;;  %v1025_v3 = vadd.f32 %v2399_v23, %v1024_v55  ;;  %v1109_v56 = vmul.f32 1.442695, %v1108_v44  ;;  %v1592_v52 = vld [vmem:[%s2655_s14 + $0x38] sm:$0xff]  ;;  %v1591_v44 = vld [vmem:[%s2655_s14 + $0x30] sm:$0xff] }
 0x193   :  { %v991_v57 = vmul.f32 %v2339_v46, %v599_v4  ;;  %v1009_v11 = vmul.f32 %v2342_v62, %v599_v4  ;;  %v966_v46 = vmul.f32 %v1704_v41, %v964_v40  ;;  %v1081_v62 = vmul.f32 1.442695, %v1080_v32  ;;  %1329 = vmatpush.bf16.msrb.mxu2 %v1592_v52 }
 0x194   :  { %v1055_v2 = vmul.f32 %v2451_v13, %v1043_v51  ;;  %v852_v33 = vmul.f32 %v2504_v0, %v2453_v28  ;;  %vm2519_vm4 = vcmp.eq.f32.partialorder %v830_v34, 8.507059e+37  ;;  %v833_v40 = vor.u32 1.1754944e-38, %v832_v9 }
 0x195   :  { %v992_v38 = vadd.f32 %v991_v57, %v990_v42  ;;  %v1010_v22 = vadd.f32 %v1009_v11, %v1008_v37  ;;  %v1134_v6 = vpack.c.bf16 %v966_v46, %v966_v46  ;;  %1717 = vpow2.f32 %v1081_v62 }
 0x196   :  { %v2523_v21 = vpop.eup %1711  ;;  %1719 = vrcp.f32 %v1025_v3  ;;  %v1056_v42 = vadd.f32 %v2455_v16, %v1055_v2  ;;  %v1073_v57 = vmul.f32 %v2441_v61, %v1043_v51  ;;  %v840_v49 = vadd.f32 %v2435_v58, %v839_v54 }
 0x197   :  { %v995_v25 = vmul.f32 %v992_v38, %v819_v45  ;;  %v1021_v10 = vmul.f32 %v2393_v53, %v1010_v22  ;;  %v1039_v4 = vmul.f32 %v2383_v12, %v1010_v22  ;;  %v1166_v53 = vunpack.c.l.b16 %v1134_v6  ;;  %1330 = vmatpush.bf16.msrb.mxu2 %v1591_v44 }
 0x198   :  { %v853_v38 = vsub.f32 1.0, %v852_v33  ;;  %1721 = vpow2.f32 %v2469_v29  ;;  %v845_v46 = vand.u32 2147483647, %v2385_v31  ;;  %vm857_vm9 = vweird.f32 %v2504_v0 }
 0x199   :  { %v997_v5 = vmul.f32 %v1708_v35, %v995_v25  ;;  %1723 = vpow2.f32 %v1109_v56  ;;  %v1074_v25 = vadd.f32 %v2483_v24, %v1073_v57  ;;  %vm856_vm10 = vweird.f32 %v2453_v28 }
 0x19a   :  { %v602_v14 = vpop.f32.mrf.mxu3  ;;  %1725 = vrcp.f32 %v1056_v42  ;;  %v854_v51 = vmul.f32 %v2504_v0, %v853_v38  ;;  %vm846_vm8 = vcmp.eq.f32.partialorder %v845_v46, 8.507059e+37  ;;  %vm2576_vm11 = vmor %vm856_vm10, %vm857_vm9  ;;  %vm871_vm14 = vweird.f32 %v2485_v63 }
 0x19b   :  { %v1022_v27 = vmul.f32 %v2399_v23, %v602_v14  ;;  %v1040_v43 = vmul.f32 %v2407_v19, %v602_v14  ;;  %v1135_v32 = vpack.c.bf16 %v997_v5, %v997_v5  ;;  %v2526_v23 = vpop.eup %1713  ;;  %v1111_v19 = vsub.f32 %v2460_v50, %v2479_v8 }
 0x19c   :  { %v2532_v11 = vpop.eup %1715  ;;  %v834_v50 = vsel %vm2519_vm4, %v833_v40, %v829_v36  ;;  %v847_v8 = vand.u32 2147483648, %v2385_v31  ;;  %v844_v31 = vsel %vm2549_vm7, %v2435_v58, %v840_v49  ;;  %v1104_v36 = vmul.f32 %v2523_v21, %v1074_v25 }
 0x19d   :  { %v1023_v7 = vadd.f32 %v1022_v27, %v1021_v10  ;;  %v1167_v15 = vunpack.c.l.b16 %v1135_v32  ;;  %v1041_v41 = vadd.f32 %v1040_v43, %v1039_v4  ;;  %v1718_v12 = vpop.eup %1717  ;;  %v867_v62 = vmul.f32 %v2532_v11, %v2485_v63  ;;  %v1590_v10 = vld [vmem:[%s2655_s14 + $0x28] sm:$0xff] }
 0x19e   :  { %v1112_v29 = vmul.f32 1.442695, %v1111_v19  ;;  %v1720_v26 = vpop.eup %1719  ;;  %v848_v9 = vor.u32 1.1754944e-38, %v847_v8  ;;  %v855_v43 = vadd.f32 %v2504_v0, %v854_v51  ;;  %v860_v32 = vand.u32 2147483647, %v2453_v28  ;;  %1331 = vmatpush.bf16.msrb.mxu2 %v1590_v10 }
 0x19f   :  { %v1173_v48 = vpack.c.b16 %v1167_v15, %v1166_v53  ;;  %v1026_v37 = vmul.f32 %v1023_v7, %v834_v50  ;;  %v1052_v22 = vmul.f32 %v2451_v13, %v1041_v41  ;;  %v1070_v58 = vmul.f32 %v2441_v61, %v1041_v41  ;;  %v1722_v6 = vpop.eup %1721 }
 0x1a0   :  { %v849_v14 = vsel %vm846_vm8, %v848_v9, %v844_v31  ;;  %v1724_v54 = vpop.eup %1723  ;;  %1727 = vpow2.f32 %v1112_v29  ;;  %v1105_v61 = vadd.f32 %v1722_v6, %v1104_v36  ;;  %v862_v40 = vand.u32 2147483648, %v2453_v28 }
 0x1a1   :  { %1241 = vmatmul.bf16.gmra.mxu0 %v1173_v48  ;;  %v1028_v13 = vmul.f32 %v1720_v26, %v1026_v37  ;;  %v1726_v27 = vpop.eup %1725  ;;  %v1589_v48 = vld [vmem:[%s2655_s14 + $0x20] sm:$0xff]  ;;  %v859_v28 = vsel %vm2576_vm11, %v2504_v0, %v855_v43  ;;  %vm861_vm12 = vcmp.eq.f32.partialorder %v860_v32, 8.507059e+37  ;;  %vm872_vm13 = vweird.f32 %v2532_v11  ;;  %v1588_v0 = vld [vmem:[%s2655_s14 + $0x18] sm:$0xff] }
 0x1a2   :  { %v604_v45 = vpop.f32.mrf.mxu3  ;;  %v1117_v53 = vmul.f32 %v1724_v54, %v1105_v61  ;;  %1332 = vmatpush.bf16.msrb.mxu2 %v1589_v48  ;;  %v875_v55 = vand.u32 2147483647, %v2485_v63  ;;  %vm873_vm15 = vmor %vm871_vm14, %vm872_vm13 }
 0x1a3   :  { %v1053_v34 = vmul.f32 %v2455_v16, %v604_v45  ;;  %v1071_v35 = vmul.f32 %v2483_v24, %v604_v45  ;;  %v868_v16 = vsub.f32 1.0, %v867_v62  ;;  %v1086_v24 = vmul.f32 %v2526_v23, %v1074_v25 }
 0x1a4   :  { %v1136_v56 = vpack.c.bf16 %v1028_v13, %v1028_v13  ;;  %vm876_vm0 = vcmp.eq.f32.partialorder %v875_v55, 8.507059e+37 }
 0x1a5   :  { %v1054_v5 = vadd.f32 %v1053_v34, %v1052_v22  ;;  %v1072_v2 = vadd.f32 %v1071_v35, %v1070_v58  ;;  %v869_v7 = vmul.f32 %v2532_v11, %v868_v16  ;;  %v1087_v4 = vadd.f32 %v1718_v12, %v1086_v24  ;;  %v1586_v24 = vld [vmem:[%s2655_s14 + $0x8] sm:$0xff] }
 0x1a6   :  { %v1728_v49 = vpop.eup %1727  ;;  %v1168_v8 = vunpack.c.l.b16 %v1136_v56  ;;  %1333 = vmatpush.bf16.msrb.mxu2 %v1588_v0 }
 0x1a7   :  { %v1057_v3 = vmul.f32 %v1054_v5, %v849_v14  ;;  %v1083_v19 = vmul.f32 %v2526_v23, %v1072_v2  ;;  %v1101_v50 = vmul.f32 %v2523_v21, %v1072_v2  ;;  %v863_v23 = vor.u32 1.1754944e-38, %v862_v40 }
 0x1a8   :  { %1729 = vrcp.f32 %v1087_v4  ;;  %v870_v62 = vadd.f32 %v2532_v11, %v869_v7  ;;  %v877_v21 = vand.u32 2147483648, %v2485_v63 }
 0x1a9   :  { %v1059_v33 = vmul.f32 %v1726_v27, %v1057_v3  ;;  %v864_v29 = vsel %vm861_vm12, %v863_v23, %v859_v28 }
 0x1aa   :  { %v607_v18 = vpop.f32.mrf.mxu3  ;;  %v874_v31 = vsel %vm873_vm15, %v2532_v11, %v870_v62  ;;  %v878_v44 = vor.u32 1.1754944e-38, %v877_v21  ;;  %v1587_v11 = vld [vmem:[%s2655_s14 + $0x10] sm:$0xff] }
 0x1ab   :  { %v1084_v42 = vmul.f32 %v1718_v12, %v607_v18  ;;  %v1102_v57 = vmul.f32 %v1722_v6, %v607_v18  ;;  %v1137_v41 = vpack.c.bf16 %v1059_v33, %v1059_v33  ;;  %v1118_v12 = vadd.f32 %v1728_v49, %v1117_v53  ;;  %1334 = vmatpush.bf16.msrb.mxu2 %v1587_v11 }
 0x1ac   :  { %v879_v51 = vsel %vm876_vm0, %v878_v44, %v874_v31 }
 0x1ad   :  { %v1085_v38 = vadd.f32 %v1084_v42, %v1083_v19  ;;  %v1169_v37 = vunpack.c.l.b16 %v1137_v41  ;;  %v1103_v46 = vadd.f32 %v1102_v57, %v1101_v50  ;;  %1731 = vrcp.f32 %v1118_v12 }
 0x1ae   :  { %v1730_v35 = vpop.eup %1729 }
 0x1af   :  { %v1174_v52 = vpack.c.b16 %v1169_v37, %v1168_v8  ;;  %v1088_v45 = vmul.f32 %v1085_v38, %v864_v29  ;;  %v1114_v22 = vmul.f32 %v1724_v54, %v1103_v46  ;;  %1335 = vmatpush.bf16.msrb.mxu2 %v1586_v24  ;;  %v1585_v54 = vld [vmem:[%s2655_s14] sm:$0xff] }
 0x1b1   :  { %1246 = vmatmul.bf16.gmra.mxu0 %v1174_v52  ;;  %v1090_v9 = vmul.f32 %v1730_v35, %v1088_v45 }
 0x1b2   :  { %v609_v25 = vpop.f32.mrf.mxu3 }
 0x1b3   :  { %v1115_v34 = vmul.f32 %v1728_v49, %v609_v25  ;;  %v1732_v5 = vpop.eup %1731  ;;  %v1138_v13 = vpack.c.bf16 %v1090_v9, %v1090_v9  ;;  %1336 = vmatpush.bf16.msrb.mxu2 %v1585_v54 }
 0x1b5   :  { %v1116_v26 = vadd.f32 %v1115_v34, %v1114_v22  ;;  %v1170_v63 = vunpack.c.l.b16 %v1138_v13 }
 0x1b7   :  { %v1119_v36 = vmul.f32 %v1116_v26, %v879_v51 }
 0x1b9   :  { %v1121_v58 = vmul.f32 %v1732_v5, %v1119_v36 }
 0x1bb   :  { %v1139_v6 = vpack.c.bf16 %v1121_v58, %v1121_v58 }
 0x1bd   :  { %v1171_v16 = vunpack.c.l.b16 %v1139_v6 }
 0x1bf   :  { %v1175_v14 = vpack.c.b16 %v1171_v16, %v1170_v63 }
 0x1c1   :  { %1251 = vmatmul.bf16.gmra.mxu0 %v1175_v14 }
 0x20e   :  { %v1237_v3 = vpop.f32.mrf.mxu0 }
 0x20f   :  { %v1238_v10 = vadd.f32 %v1237_v3, %v1931_v20 }
 0x216   :  { %v1239_v2 = vpop.f32.mrf.mxu0 }
 0x217   :  { %v1240_v27 = vadd.f32 %v1239_v2, %v1953_v39 }
 0x219   :  { %v1257_v43 = vpack.c.bf16 %v1240_v27, %v1238_v10 }
 0x21b   :  { %1337 = vmatmul.bf16.vlgmr.msrb.gmra.mxu2 %v1257_v43 }
 0x21e   :  { %v1242_v61 = vpop.f32.mrf.mxu0 }
 0x21f   :  { %v1243_v33 = vadd.f32 %v1242_v61, %v1971_v1  ;;  %v1606_v1 = vld [vmem:[%s2656_s15] ss:$0 sm:$0xff] }
 0x226   :  { %v1244_v32 = vpop.f32.mrf.mxu0 }
 0x227   :  { %v1245_v56 = vadd.f32 %v1244_v32, %v1993_v30 }
 0x229   :  { %v1258_v18 = vpack.c.bf16 %v1245_v56, %v1243_v33 }
 0x22b   :  { %1342 = vmatmul.bf16.gmra.mxu2 %v1258_v18 }
 0x22e   :  { %v1247_v40 = vpop.f32.mrf.mxu0 }
 0x22f   :  { %v1248_v4 = vadd.f32 %v1247_v40, %v2021_v60 }
 0x236   :  { %v1249_v7 = vpop.f32.mrf.mxu0 }
 0x237   :  { %v1250_v53 = vadd.f32 %v1249_v7, %v2040_v17 }
 0x239   :  { %v1259_v15 = vpack.c.bf16 %v1250_v53, %v1248_v4 }
 0x23b   :  { %1347 = vmatmul.bf16.gmra.mxu2 %v1259_v15 }
 0x23e   :  { %v1252_v20 = vpop.f32.mrf.mxu0 }
 0x23f   :  { %v1253_v19 = vadd.f32 %v1252_v20, %v2057_v47 }
 0x246   :  { %v1254_v39 = vpop.f32.mrf.mxu0 }
 0x247   :  { %v1255_v42 = vadd.f32 %v1254_v39, %v2067_v59 }
 0x249   :  { %v1260_v57 = vpack.c.bf16 %v1255_v42, %v1253_v19 }
 0x24b   :  { %1352 = vmatmul.bf16.gmra.mxu2 %v1260_v57 }
 0x29e   :  { %v1338_v30 = vpop.f32.mrf.mxu2 }
 0x29f   :  { %v1339_v41 = vadd.f32 %v1606_v1, %v1338_v30 }
 0x2a1   :  { %1358 = vst [vmem:[%s2657_s16] sm:$0xff] %v1339_v41 }
 0x2a6   :  { %v1340_v60 = vpop.f32.mrf.mxu2 }
 0x2a7   :  { %v1341_v17 = vadd.f32 %v1606_v1, %v1340_v60 }
 0x2a9   :  { %1359 = vst [vmem:[%s2657_s16 + $0x8] sm:$0xff] %v1341_v17 }
 0x2ae   :  { %v1343_v47 = vpop.f32.mrf.mxu2 }
 0x2af   :  { %v1344_v59 = vadd.f32 %v1606_v1, %v1343_v47 }
 0x2b1   :  { %1360 = vst [vmem:[%s2657_s16 + $0x10] sm:$0xff] %v1344_v59 }
 0x2b6   :  { %v1345_v48 = vpop.f32.mrf.mxu2 }
 0x2b7   :  { %v1346_v28 = vadd.f32 %v1606_v1, %v1345_v48 }
 0x2b9   :  { %1361 = vst [vmem:[%s2657_s16 + $0x18] sm:$0xff] %v1346_v28 }
 0x2be   :  { %v1348_v49 = vpop.f32.mrf.mxu2 }
 0x2bf   :  { %v1349_v38 = vadd.f32 %v1606_v1, %v1348_v49 }
 0x2c1   :  { %1362 = vst [vmem:[%s2657_s16 + $0x20] sm:$0xff] %v1349_v38 }
 0x2c6   :  { %v1350_v50 = vpop.f32.mrf.mxu2 }
 0x2c7   :  { %v1351_v8 = vadd.f32 %v1606_v1, %v1350_v50 }
 0x2c9   :  { %1363 = vst [vmem:[%s2657_s16 + $0x28] sm:$0xff] %v1351_v8 }
 0x2ce   :  { %v1353_v37 = vpop.f32.mrf.mxu2 }
 0x2cf   :  { %v1354_v23 = vadd.f32 %v1606_v1, %v1353_v37 }
 0x2d1   :  { %1364 = vst [vmem:[%s2657_s16 + $0x30] sm:$0xff] %v1354_v23 }
 0x2d6   :  { %v1355_v12 = vpop.f32.mrf.mxu2 }
 0x2d7   :  { %v1356_v46 = vadd.f32 %v1606_v1, %v1355_v12 }
 0x2d9   :  { %1365 = vst [vmem:[%s2657_s16 + $0x38] sm:$0xff] %v1356_v46 }

</bundles_post_ra>
